<compile_context>
chip_gen: v7x
topology: tpu7x:2x2x1
jax: 0.10.0
libtpu: 0.0.40
codegen_flags: <defaults>
</compile_context>

<pallas_src>
import numpy as np
import jax
import jax.numpy as jnp
from jax.experimental import pallas as pl
from jax.experimental.pallas import tpu as pltpu

# ----------------------- configuration (PQN defaults) -----------------------
N_QUBITS = 8
DIM = 1 << N_QUBITS          # 256 statevector amplitudes
NUM_LAYERS = 3               # BasicEntanglerLayers depth
IN_DIM = 1                   # PQN input_dim
HID = N_QUBITS               # PQN hidden_dim == n_qubits
OUT_DIM = 1                  # PQN output_dim
BATCH = 8                    # one full sublane group

# ----------- tiny host-side index tables (int indices, never DMA'd) ---------
_IDX = np.arange(DIM)
# X on wire q: basis permutation j -> j ^ 2^q
_XPERM = np.stack([_IDX ^ (1 << q) for q in range(N_QUBITS)])                 # (8,256)
# CNOT(i, (i+1)%8): j -> j ^ (bit_i(j) << target)   (involution)
_CNOT_PERM = np.stack(
    [_IDX ^ (((_IDX >> i) & 1) << ((i + 1) % N_QUBITS)) for i in range(N_QUBITS)])
# <Z_q> signs per basis state
_ZSIGN = (1.0 - 2.0 * ((_IDX[:, None] >> np.arange(N_QUBITS)[None, :]) & 1)
          ).astype(np.float32)                                                # (256,8)


# -------------------- batch-independent circuit folding ---------------------
def _build_folded_unitary(qweights, rx_angles):
    """Fold BasicEntanglerLayers(RX + CNOT ring) + final per-wire RX into one
    256x256 unitary M (row-vector convention: psi_out = psi_in @ M).
    Returns the real 512x512 block matrix [[Re, Im], [-Im, Re]].
    Pure jnp; depends only on parameters."""
    re = jnp.eye(DIM, dtype=jnp.float32)
    im = jnp.zeros((DIM, DIM), jnp.float32)

    def rx(re, im, theta, q):
        c = jnp.cos(0.5 * theta)
        s = jnp.sin(0.5 * theta)
        xre = re[:, _XPERM[q]]
        xim = im[:, _XPERM[q]]
        # M @ RX_q:  new col j = cos * col_j - i*sin * col_{j^2^q}
        return c * re + s * xim, c * im - s * xre

    for l in range(NUM_LAYERS):
        for q in range(N_QUBITS):
            re, im = rx(re, im, qweights[l, q], q)
        for i in range(N_QUBITS):
            re = re[:, _CNOT_PERM[i]]
            im = im[:, _CNOT_PERM[i]]
    for q in range(N_QUBITS):
        re, im = rx(re, im, rx_angles[q], q)

    top = jnp.concatenate([re, im], axis=1)        # [Re  Im]
    bot = jnp.concatenate([-im, re], axis=1)       # [-Im Re]
    return jnp.concatenate([top, bot], axis=0)     # (512, 512)


# ------------------------------ Pallas kernel --------------------------------
def _pqn_kernel(cin_ref, sin_ref, mbig_ref, zw2_ref, b2_ref, out_ref):
    B = cin_ref.shape[0]
    c = cin_ref[...]                               # (B, 8)  cos(theta_q / 2)
    s = sin_ref[...]                               # (B, 8)  sin(theta_q / 2)

    # AngleEmbedding on |0...0> is a product state:
    #   amp_j = [prod_q (c_q if bit_q(j)==0 else s_q)] * (-i)^popcount(j)
    # Build the packed [Re | Im] (B, 512) slab directly; basis index = lane & 255.
    lane = jax.lax.broadcasted_iota(jnp.int32, (B, 2 * DIM), 1)
    j = lane & (DIM - 1)
    is_im = lane >> N_QUBITS                       # 0 -> Re half, 1 -> Im half

    mag = jnp.ones((B, 2 * DIM), jnp.float32)
    pop = jnp.zeros((B, 2 * DIM), jnp.int32)
    for q in range(N_QUBITS):
        bit = (j >> q) & 1
        mag = mag * jnp.where(bit == 1, s[:, q:q + 1], c[:, q:q + 1])
        pop = pop + bit
    k = pop & 3                                    # (-i)^k phase
    re_sign = jnp.where(k == 0, 1.0, jnp.where(k == 2, -1.0, 0.0))
    im_sign = jnp.where(k == 1, -1.0, jnp.where(k == 3, 1.0, 0.0))
    psi = mag * jnp.where(is_im == 0, re_sign, im_sign)   # (B, 512)

    # Folded batch-independent unitary: ONE (B,512)@(512,512) real MXU dot
    # computing [Re(psi M) | Im(psi M)].
    y = jnp.dot(psi, mbig_ref[...], preferred_element_type=jnp.float32)

    # Readout + clayer_2 folded:
    #   out = (Re^2 + Im^2) @ (ZSIGN @ W2) + b2  ==  (y*y) @ [ZW2; ZW2] + b2
    out = jnp.dot(y * y, zw2_ref[...], preferred_element_type=jnp.float32)
    out_ref[...] = out + b2_ref[...]


# ------------------------------ forward wrapper ------------------------------
def pqn_forward(x, params):
    W1, b1, qweights, rx_angles, W2, b2 = params
    B = x.shape[0]

    # clayer_1 + half-angle trig: tiny (B,8) work, one XLA fusion, no extra launch.
    angles = x @ W1 + b1
    cin = jnp.cos(0.5 * angles)
    sn = jnp.sin(0.5 * angles)

    # Batch-independent circuit -> single 512x512 real block matrix (param-only).
    mbig = _build_folded_unitary(qweights, rx_angles)          # (512, 512), 1 MiB
    # Fold <Z_q> signs into the output projection, duplicated for the Im half.
    zw2 = jnp.asarray(_ZSIGN) @ W2                              # (256, OUT_DIM)
    zw2_big = jnp.concatenate([zw2, zw2], axis=0)               # (512, OUT_DIM)

    vmem = pl.BlockSpec(memory_space=pltpu.MemorySpace.VMEM)
    return pl.pallas_call(
        _pqn_kernel,
        out_shape=jax.ShapeDtypeStruct((B, OUT_DIM), jnp.float32),
        in_specs=[vmem] * 5,
        out_specs=vmem,
        # grid=() on purpose: at B=8 the whole problem is a few vregs + one
        # 1 MiB weight slab; a batch grid axis only pays off at much larger
        # batch (v7x dual-TC sharding), here it is pure per-step overhead.
    )(cin, sn, mbig, zw2_big, b2.reshape(1, OUT_DIM))


# --------------------------- numpy reference (f64) ---------------------------
def _ref_forward_np(x, params):
    W1, b1, qw, rxang, W2, b2 = [np.asarray(p, np.float64) for p in params]
    x = np.asarray(x, np.float64)
    angles = x @ W1 + b1

    def rx_mat(t):
        c, s = np.cos(t / 2.0), np.sin(t / 2.0)
        return np.array([[c, -1j * s], [-1j * s, c]], np.complex128)

    CN = np.array([[1, 0, 0, 0], [0, 1, 0, 0], [0, 0, 0, 1], [0, 0, 1, 0]],
                  np.complex128)

    def apply_1q(state, U, w):
        st = np.moveaxis(state, w, 0)
        st = np.tensordot(U, st, axes=((1,), (0,)))
        return np.moveaxis(st, 0, w)

    def apply_2q(state, U4, wc, wt):
        st = np.moveaxis(state, (wc, wt), (0, 1))
        st = np.tensordot(U4.reshape(2, 2, 2, 2), st, axes=((2, 3), (0, 1)))
        return np.moveaxis(st, (0, 1), (wc, wt))

    outs = []
    for b in range(x.shape[0]):
        state = np.zeros((2,) * N_QUBITS, np.complex128)
        state[(0,) * N_QUBITS] = 1.0
        for q in range(N_QUBITS):
            state = apply_1q(state, rx_mat(angles[b, q]), q)
        for l in range(NUM_LAYERS):
            for q in range(N_QUBITS):
                state = apply_1q(state, rx_mat(qw[l, q]), q)
            for i in range(N_QUBITS):
                state = apply_2q(state, CN, i, (i + 1) % N_QUBITS)
        for q in range(N_QUBITS):
            state = apply_1q(state, rx_mat(rxang[q]), q)
        probs = np.abs(state) ** 2
        ez = []
        for q in range(N_QUBITS):
            p = np.moveaxis(probs, q, 0)
            ez.append(p[0].sum() - p[1].sum())
        outs.append(np.array(ez))
    exp_z = np.stack(outs)
    return exp_z @ W2 + b2


# ----------------------------------- main ------------------------------------
if __name__ == "__main__":
    key = jax.random.PRNGKey(0)
    ks = jax.random.split(key, 7)

    bound1 = 1.0 / np.sqrt(IN_DIM)
    W1 = jax.random.uniform(ks[0], (IN_DIM, HID), jnp.float32, -bound1, bound1)
    b1 = jax.random.uniform(ks[1], (HID,), jnp.float32, -bound1, bound1)
    qweights = jax.random.uniform(ks[2], (NUM_LAYERS, N_QUBITS), jnp.float32,
                                  0.0, 2.0 * np.pi)
    rx_angles = jax.random.uniform(ks[3], (N_QUBITS,), jnp.float32,
                                   0.0, 2.0 * np.pi)
    bound2 = 1.0 / np.sqrt(HID)
    W2 = jax.random.uniform(ks[4], (HID, OUT_DIM), jnp.float32, -bound2, bound2)
    b2 = jax.random.uniform(ks[5], (OUT_DIM,), jnp.float32, -bound2, bound2)

    x = jax.random.normal(ks[6], (BATCH, IN_DIM), jnp.float32)   # PQN `src`

    params = (W1, b1, qweights, rx_angles, W2, b2)
    out = jax.jit(pqn_forward)(x, params)
    out = jax.block_until_ready(out)

    ref = _ref_forward_np(np.asarray(x), [np.asarray(p) for p in params])
    np.testing.assert_allclose(np.asarray(out), ref, atol=5e-2, rtol=0.0)
    print("KERNEL_OK")
</pallas_src>

<mosaic_0001>
module attributes {stable_mosaic.version = 11 : i64} {
  func.func @_pqn_kernel(%arg0: memref<8x8xf32, #tpu.memory_space<vmem>>, %arg1: memref<8x8xf32, #tpu.memory_space<vmem>>, %arg2: memref<512x512xf32, #tpu.memory_space<vmem>>, %arg3: memref<512x1xf32, #tpu.memory_space<vmem>>, %arg4: memref<1x1xf32, #tpu.memory_space<vmem>>, %arg5: memref<8x1xf32, #tpu.memory_space<vmem>>) attributes {dimension_semantics = [], scalar_prefetch = 0 : i64, scratch_operands = 0 : i64, tpu.core_type = #tpu.core_type<tc>} {
    %c0 = arith.constant 0 : index
    %c0_0 = arith.constant 0 : index
    %0 = vector.load %arg0[%c0, %c0_0] : memref<8x8xf32, #tpu.memory_space<vmem>>, vector<8x8xf32>
    %c0_1 = arith.constant 0 : index
    %c0_2 = arith.constant 0 : index
    %1 = vector.load %arg1[%c0_1, %c0_2] : memref<8x8xf32, #tpu.memory_space<vmem>>, vector<8x8xf32>
    %2 = tpu.iota {dimensions = array<i32: 1>} : vector<8x512xi32>
    %c255_i32 = arith.constant 255 : i32
    %3 = vector.broadcast %c255_i32 : i32 to vector<8x512xi32>
    %4 = arith.andi %2, %3 : vector<8x512xi32>
    %c8_i32 = arith.constant 8 : i32
    %5 = vector.broadcast %c8_i32 : i32 to vector<8x512xi32>
    %6 = arith.shrsi %2, %5 : vector<8x512xi32>
    %cst = arith.constant 1.000000e+00 : f32
    %7 = vector.broadcast %cst : f32 to vector<8x512xf32>
    %c0_i32 = arith.constant 0 : i32
    %8 = vector.broadcast %c0_i32 : i32 to vector<8x512xi32>
    %c0_i32_3 = arith.constant 0 : i32
    %9 = vector.broadcast %c0_i32_3 : i32 to vector<8x512xi32>
    %10 = arith.shrsi %4, %9 : vector<8x512xi32>
    %c1_i32 = arith.constant 1 : i32
    %11 = vector.broadcast %c1_i32 : i32 to vector<8x512xi32>
    %12 = arith.andi %10, %11 : vector<8x512xi32>
    %c1_i32_4 = arith.constant 1 : i32
    %13 = vector.broadcast %c1_i32_4 : i32 to vector<8x512xi32>
    %14 = arith.cmpi eq, %12, %13 : vector<8x512xi32>
    %15 = vector.extract_strided_slice %1 {offsets = [0, 0], sizes = [8, 1], strides = [1, 1]} : vector<8x8xf32> to vector<8x1xf32>
    %16 = vector.extract_strided_slice %0 {offsets = [0, 0], sizes = [8, 1], strides = [1, 1]} : vector<8x8xf32> to vector<8x1xf32>
    %17 = vector.shape_cast %15 : vector<8x1xf32> to vector<8x1xf32>
    %18 = vector.broadcast %17 : vector<8x1xf32> to vector<8x512xf32>
    %19 = vector.shape_cast %16 : vector<8x1xf32> to vector<8x1xf32>
    %20 = vector.broadcast %19 : vector<8x1xf32> to vector<8x512xf32>
    %21 = arith.select %14, %18, %20 : vector<8x512xi1>, vector<8x512xf32>
    %22 = arith.mulf %7, %21 : vector<8x512xf32>
    %23 = arith.addi %8, %12 : vector<8x512xi32>
    %c1_i32_5 = arith.constant 1 : i32
    %24 = vector.broadcast %c1_i32_5 : i32 to vector<8x512xi32>
    %25 = arith.shrsi %4, %24 : vector<8x512xi32>
    %c1_i32_6 = arith.constant 1 : i32
    %26 = vector.broadcast %c1_i32_6 : i32 to vector<8x512xi32>
    %27 = arith.andi %25, %26 : vector<8x512xi32>
    %c1_i32_7 = arith.constant 1 : i32
    %28 = vector.broadcast %c1_i32_7 : i32 to vector<8x512xi32>
    %29 = arith.cmpi eq, %27, %28 : vector<8x512xi32>
    %30 = vector.extract_strided_slice %1 {offsets = [0, 1], sizes = [8, 1], strides = [1, 1]} : vector<8x8xf32> to vector<8x1xf32>
    %31 = vector.extract_strided_slice %0 {offsets = [0, 1], sizes = [8, 1], strides = [1, 1]} : vector<8x8xf32> to vector<8x1xf32>
    %32 = vector.shape_cast %30 : vector<8x1xf32> to vector<8x1xf32>
    %33 = vector.broadcast %32 : vector<8x1xf32> to vector<8x512xf32>
    %34 = vector.shape_cast %31 : vector<8x1xf32> to vector<8x1xf32>
    %35 = vector.broadcast %34 : vector<8x1xf32> to vector<8x512xf32>
    %36 = arith.select %29, %33, %35 : vector<8x512xi1>, vector<8x512xf32>
    %37 = arith.mulf %22, %36 : vector<8x512xf32>
    %38 = arith.addi %23, %27 : vector<8x512xi32>
    %c2_i32 = arith.constant 2 : i32
    %39 = vector.broadcast %c2_i32 : i32 to vector<8x512xi32>
    %40 = arith.shrsi %4, %39 : vector<8x512xi32>
    %c1_i32_8 = arith.constant 1 : i32
    %41 = vector.broadcast %c1_i32_8 : i32 to vector<8x512xi32>
    %42 = arith.andi %40, %41 : vector<8x512xi32>
    %c1_i32_9 = arith.constant 1 : i32
    %43 = vector.broadcast %c1_i32_9 : i32 to vector<8x512xi32>
    %44 = arith.cmpi eq, %42, %43 : vector<8x512xi32>
    %45 = vector.extract_strided_slice %1 {offsets = [0, 2], sizes = [8, 1], strides = [1, 1]} : vector<8x8xf32> to vector<8x1xf32>
    %46 = vector.extract_strided_slice %0 {offsets = [0, 2], sizes = [8, 1], strides = [1, 1]} : vector<8x8xf32> to vector<8x1xf32>
    %47 = vector.shape_cast %45 : vector<8x1xf32> to vector<8x1xf32>
    %48 = vector.broadcast %47 : vector<8x1xf32> to vector<8x512xf32>
    %49 = vector.shape_cast %46 : vector<8x1xf32> to vector<8x1xf32>
    %50 = vector.broadcast %49 : vector<8x1xf32> to vector<8x512xf32>
    %51 = arith.select %44, %48, %50 : vector<8x512xi1>, vector<8x512xf32>
    %52 = arith.mulf %37, %51 : vector<8x512xf32>
    %53 = arith.addi %38, %42 : vector<8x512xi32>
    %c3_i32 = arith.constant 3 : i32
    %54 = vector.broadcast %c3_i32 : i32 to vector<8x512xi32>
    %55 = arith.shrsi %4, %54 : vector<8x512xi32>
    %c1_i32_10 = arith.constant 1 : i32
    %56 = vector.broadcast %c1_i32_10 : i32 to vector<8x512xi32>
    %57 = arith.andi %55, %56 : vector<8x512xi32>
    %c1_i32_11 = arith.constant 1 : i32
    %58 = vector.broadcast %c1_i32_11 : i32 to vector<8x512xi32>
    %59 = arith.cmpi eq, %57, %58 : vector<8x512xi32>
    %60 = vector.extract_strided_slice %1 {offsets = [0, 3], sizes = [8, 1], strides = [1, 1]} : vector<8x8xf32> to vector<8x1xf32>
    %61 = vector.extract_strided_slice %0 {offsets = [0, 3], sizes = [8, 1], strides = [1, 1]} : vector<8x8xf32> to vector<8x1xf32>
    %62 = vector.shape_cast %60 : vector<8x1xf32> to vector<8x1xf32>
    %63 = vector.broadcast %62 : vector<8x1xf32> to vector<8x512xf32>
    %64 = vector.shape_cast %61 : vector<8x1xf32> to vector<8x1xf32>
    %65 = vector.broadcast %64 : vector<8x1xf32> to vector<8x512xf32>
    %66 = arith.select %59, %63, %65 : vector<8x512xi1>, vector<8x512xf32>
    %67 = arith.mulf %52, %66 : vector<8x512xf32>
    %68 = arith.addi %53, %57 : vector<8x512xi32>
    %c4_i32 = arith.constant 4 : i32
    %69 = vector.broadcast %c4_i32 : i32 to vector<8x512xi32>
    %70 = arith.shrsi %4, %69 : vector<8x512xi32>
    %c1_i32_12 = arith.constant 1 : i32
    %71 = vector.broadcast %c1_i32_12 : i32 to vector<8x512xi32>
    %72 = arith.andi %70, %71 : vector<8x512xi32>
    %c1_i32_13 = arith.constant 1 : i32
    %73 = vector.broadcast %c1_i32_13 : i32 to vector<8x512xi32>
    %74 = arith.cmpi eq, %72, %73 : vector<8x512xi32>
    %75 = vector.extract_strided_slice %1 {offsets = [0, 4], sizes = [8, 1], strides = [1, 1]} : vector<8x8xf32> to vector<8x1xf32>
    %76 = vector.extract_strided_slice %0 {offsets = [0, 4], sizes = [8, 1], strides = [1, 1]} : vector<8x8xf32> to vector<8x1xf32>
    %77 = vector.shape_cast %75 : vector<8x1xf32> to vector<8x1xf32>
    %78 = vector.broadcast %77 : vector<8x1xf32> to vector<8x512xf32>
    %79 = vector.shape_cast %76 : vector<8x1xf32> to vector<8x1xf32>
    %80 = vector.broadcast %79 : vector<8x1xf32> to vector<8x512xf32>
    %81 = arith.select %74, %78, %80 : vector<8x512xi1>, vector<8x512xf32>
    %82 = arith.mulf %67, %81 : vector<8x512xf32>
    %83 = arith.addi %68, %72 : vector<8x512xi32>
    %c5_i32 = arith.constant 5 : i32
    %84 = vector.broadcast %c5_i32 : i32 to vector<8x512xi32>
    %85 = arith.shrsi %4, %84 : vector<8x512xi32>
    %c1_i32_14 = arith.constant 1 : i32
    %86 = vector.broadcast %c1_i32_14 : i32 to vector<8x512xi32>
    %87 = arith.andi %85, %86 : vector<8x512xi32>
    %c1_i32_15 = arith.constant 1 : i32
    %88 = vector.broadcast %c1_i32_15 : i32 to vector<8x512xi32>
    %89 = arith.cmpi eq, %87, %88 : vector<8x512xi32>
    %90 = vector.extract_strided_slice %1 {offsets = [0, 5], sizes = [8, 1], strides = [1, 1]} : vector<8x8xf32> to vector<8x1xf32>
    %91 = vector.extract_strided_slice %0 {offsets = [0, 5], sizes = [8, 1], strides = [1, 1]} : vector<8x8xf32> to vector<8x1xf32>
    %92 = vector.shape_cast %90 : vector<8x1xf32> to vector<8x1xf32>
    %93 = vector.broadcast %92 : vector<8x1xf32> to vector<8x512xf32>
    %94 = vector.shape_cast %91 : vector<8x1xf32> to vector<8x1xf32>
    %95 = vector.broadcast %94 : vector<8x1xf32> to vector<8x512xf32>
    %96 = arith.select %89, %93, %95 : vector<8x512xi1>, vector<8x512xf32>
    %97 = arith.mulf %82, %96 : vector<8x512xf32>
    %98 = arith.addi %83, %87 : vector<8x512xi32>
    %c6_i32 = arith.constant 6 : i32
    %99 = vector.broadcast %c6_i32 : i32 to vector<8x512xi32>
    %100 = arith.shrsi %4, %99 : vector<8x512xi32>
    %c1_i32_16 = arith.constant 1 : i32
    %101 = vector.broadcast %c1_i32_16 : i32 to vector<8x512xi32>
    %102 = arith.andi %100, %101 : vector<8x512xi32>
    %c1_i32_17 = arith.constant 1 : i32
    %103 = vector.broadcast %c1_i32_17 : i32 to vector<8x512xi32>
    %104 = arith.cmpi eq, %102, %103 : vector<8x512xi32>
    %105 = vector.extract_strided_slice %1 {offsets = [0, 6], sizes = [8, 1], strides = [1, 1]} : vector<8x8xf32> to vector<8x1xf32>
    %106 = vector.extract_strided_slice %0 {offsets = [0, 6], sizes = [8, 1], strides = [1, 1]} : vector<8x8xf32> to vector<8x1xf32>
    %107 = vector.shape_cast %105 : vector<8x1xf32> to vector<8x1xf32>
    %108 = vector.broadcast %107 : vector<8x1xf32> to vector<8x512xf32>
    %109 = vector.shape_cast %106 : vector<8x1xf32> to vector<8x1xf32>
    %110 = vector.broadcast %109 : vector<8x1xf32> to vector<8x512xf32>
    %111 = arith.select %104, %108, %110 : vector<8x512xi1>, vector<8x512xf32>
    %112 = arith.mulf %97, %111 : vector<8x512xf32>
    %113 = arith.addi %98, %102 : vector<8x512xi32>
    %c7_i32 = arith.constant 7 : i32
    %114 = vector.broadcast %c7_i32 : i32 to vector<8x512xi32>
    %115 = arith.shrsi %4, %114 : vector<8x512xi32>
    %c1_i32_18 = arith.constant 1 : i32
    %116 = vector.broadcast %c1_i32_18 : i32 to vector<8x512xi32>
    %117 = arith.andi %115, %116 : vector<8x512xi32>
    %c1_i32_19 = arith.constant 1 : i32
    %118 = vector.broadcast %c1_i32_19 : i32 to vector<8x512xi32>
    %119 = arith.cmpi eq, %117, %118 : vector<8x512xi32>
    %120 = vector.extract_strided_slice %1 {offsets = [0, 7], sizes = [8, 1], strides = [1, 1]} : vector<8x8xf32> to vector<8x1xf32>
    %121 = vector.extract_strided_slice %0 {offsets = [0, 7], sizes = [8, 1], strides = [1, 1]} : vector<8x8xf32> to vector<8x1xf32>
    %122 = vector.shape_cast %120 : vector<8x1xf32> to vector<8x1xf32>
    %123 = vector.broadcast %122 : vector<8x1xf32> to vector<8x512xf32>
    %124 = vector.shape_cast %121 : vector<8x1xf32> to vector<8x1xf32>
    %125 = vector.broadcast %124 : vector<8x1xf32> to vector<8x512xf32>
    %126 = arith.select %119, %123, %125 : vector<8x512xi1>, vector<8x512xf32>
    %127 = arith.mulf %112, %126 : vector<8x512xf32>
    %128 = arith.addi %113, %117 : vector<8x512xi32>
    %c3_i32_20 = arith.constant 3 : i32
    %129 = vector.broadcast %c3_i32_20 : i32 to vector<8x512xi32>
    %130 = arith.andi %128, %129 : vector<8x512xi32>
    %c0_i32_21 = arith.constant 0 : i32
    %131 = vector.broadcast %c0_i32_21 : i32 to vector<8x512xi32>
    %132 = arith.cmpi eq, %130, %131 : vector<8x512xi32>
    %c2_i32_22 = arith.constant 2 : i32
    %133 = vector.broadcast %c2_i32_22 : i32 to vector<8x512xi32>
    %134 = arith.cmpi eq, %130, %133 : vector<8x512xi32>
    %cst_23 = arith.constant -1.000000e+00 : f32
    %cst_24 = arith.constant 0.000000e+00 : f32
    %135 = vector.broadcast %cst_23 : f32 to vector<8x512xf32>
    %136 = vector.broadcast %cst_24 : f32 to vector<8x512xf32>
    %137 = arith.select %134, %135, %136 : vector<8x512xi1>, vector<8x512xf32>
    %cst_25 = arith.constant 1.000000e+00 : f32
    %138 = vector.broadcast %cst_25 : f32 to vector<8x512xf32>
    %139 = arith.select %132, %138, %137 : vector<8x512xi1>, vector<8x512xf32>
    %c1_i32_26 = arith.constant 1 : i32
    %140 = vector.broadcast %c1_i32_26 : i32 to vector<8x512xi32>
    %141 = arith.cmpi eq, %130, %140 : vector<8x512xi32>
    %c3_i32_27 = arith.constant 3 : i32
    %142 = vector.broadcast %c3_i32_27 : i32 to vector<8x512xi32>
    %143 = arith.cmpi eq, %130, %142 : vector<8x512xi32>
    %cst_28 = arith.constant 1.000000e+00 : f32
    %cst_29 = arith.constant 0.000000e+00 : f32
    %144 = vector.broadcast %cst_28 : f32 to vector<8x512xf32>
    %145 = vector.broadcast %cst_29 : f32 to vector<8x512xf32>
    %146 = arith.select %143, %144, %145 : vector<8x512xi1>, vector<8x512xf32>
    %cst_30 = arith.constant -1.000000e+00 : f32
    %147 = vector.broadcast %cst_30 : f32 to vector<8x512xf32>
    %148 = arith.select %141, %147, %146 : vector<8x512xi1>, vector<8x512xf32>
    %c0_i32_31 = arith.constant 0 : i32
    %149 = vector.broadcast %c0_i32_31 : i32 to vector<8x512xi32>
    %150 = arith.cmpi eq, %6, %149 : vector<8x512xi32>
    %151 = arith.select %150, %139, %148 : vector<8x512xi1>, vector<8x512xf32>
    %152 = arith.mulf %127, %151 : vector<8x512xf32>
    %c0_32 = arith.constant 0 : index
    %c0_33 = arith.constant 0 : index
    %153 = vector.load %arg2[%c0_32, %c0_33] : memref<512x512xf32, #tpu.memory_space<vmem>>, vector<512x512xf32>
    %cst_34 = arith.constant dense<0.000000e+00> : vector<8x512xf32>
    %154 = tpu.matmul %152, %153, %cst_34 {dimension_numbers = #tpu.dot_dimension_numbers<[1], [0], [0], [1], [0, 0, 1, 1], [], []>} : vector<8x512xf32>, vector<512x512xf32>, vector<8x512xf32> -> vector<8x512xf32>
    %155 = arith.mulf %154, %154 : vector<8x512xf32>
    %c0_35 = arith.constant 0 : index
    %c0_36 = arith.constant 0 : index
    %156 = vector.load %arg3[%c0_35, %c0_36] : memref<512x1xf32, #tpu.memory_space<vmem>>, vector<512x1xf32>
    %cst_37 = arith.constant dense<0.000000e+00> : vector<8x1xf32>
    %157 = tpu.matmul %155, %156, %cst_37 {dimension_numbers = #tpu.dot_dimension_numbers<[1], [0], [0], [1], [0, 0, 1, 1], [], []>} : vector<8x512xf32>, vector<512x1xf32>, vector<8x1xf32> -> vector<8x1xf32>
    %c0_38 = arith.constant 0 : index
    %c0_39 = arith.constant 0 : index
    %158 = vector.load %arg4[%c0_38, %c0_39] : memref<1x1xf32, #tpu.memory_space<vmem>>, vector<1x1xf32>
    %159 = vector.broadcast %158 : vector<1x1xf32> to vector<8x1xf32>
    %160 = arith.addf %157, %159 : vector<8x1xf32>
    %c0_40 = arith.constant 0 : index
    %c0_41 = arith.constant 0 : index
    %161 = vector.load %arg5[%c0_40, %c0_41] : memref<8x1xf32, #tpu.memory_space<vmem>>, vector<8x1xf32>
    tpu.vector_store %arg5[%c0_40, %c0_41], %160 {strides = array<i32>} : memref<8x1xf32, #tpu.memory_space<vmem>>, vector<8x1xf32>,
    return
  }
}

</mosaic_0001>

<bundles_post_ra>
// kernel: pqn_forward.1
= control target key start
LH: loop header
LB: loop body
LE: loop exit
PB: predicated region body
PF: predicated region fallthrough
CT: control target
= control target key end

     0   :  { %v1509_v0 = vmov 1   ;;  %v1510_v1 = vmov 0   ;;  %v24_v25 = vlaneseq  ;;  %v1511_v37 = vmov 2   ;;  %s2936_s1 = inlined_call_operand.vmem [shape: f32[8,8], index: 1, kind: input, shape index: {}]   ;;  %s2937_s0 = inlined_call_operand.vmem [shape: f32[8,8], index: 0, kind: input, shape index: {}]   ;;  %s2938_s2 = inlined_call_operand.vmem [shape: f32[512,512], index: 2, kind: input, shape index: {}]   ;;  %s2939_s3 = inlined_call_operand.vmem [shape: f32[512,1], index: 3, kind: input, shape index: {}]   ;;  %s2940_s4 = inlined_call_operand.<no memory space> [shape: f32[1,1], index: 4, kind: input, shape index: {}]   ;;  %s2941_s5 = inlined_call_operand.vmem [shape: f32[8,1], index: 5, kind: output, shape index: {}]  }
   0x1   :  { %1497 = vset.pattern.permute.xlu1 %v1509_v0  ;;  %1496 = vset.pattern.permute.xlu0 %v1510_v1  ;;  %v1551_v2 = vld [vmem:[%s2936_s1] sm:$0xff]  ;;  %v332_v4 = vld [vmem:[%s2938_s2 + $0x8] sm:$0xff]  ;;  %v334_v6 = vld [vmem:[%s2938_s2 + $0x18] sm:$0xff]  ;;  %v1512_v52 = vmov 3  }
   0x2   :  { %v1556_v3 = vld [vmem:[%s2937_s0] sm:$0xff]  ;;  %72 = vperm.xlu1 %1497, %v1551_v2   ;;  %47 = vperm.xlu0 %1496, %v1551_v2   ;;  %v336_v5 = vld [vmem:[%s2938_s2 + $0x28] sm:$0xff]  ;;  %v338_v8 = vld [vmem:[%s2938_s2 + $0x38] sm:$0xff]  ;;  %v1637_v41 = vand.u32 127, %v24_v25 }
   0x3   :  { %v1163_v7 = vpack.c.bf16 %v336_v5, %v332_v4  ;;  %v331_v9 = vld [vmem:[%s2938_s2] sm:$0xff]  ;;  %v1291_v11 = vpack.c.bf16 %v338_v8, %v334_v6  ;;  %v333_v13 = vld [vmem:[%s2938_s2 + $0x10] sm:$0xff]  ;;  %v340_v15 = vld [vmem:[%s2938_s2 + $0x48] sm:$0xff]  ;;  %v1513_v5 = vmov 4   ;;  %v1514_v6 = vmov 5  }
   0x4   :  { %v335_v10 = vld [vmem:[%s2938_s2 + $0x20] sm:$0xff]  ;;  %v337_v14 = vld [vmem:[%s2938_s2 + $0x30] sm:$0xff]  ;;  %v344_v17 = vld [vmem:[%s2938_s2 + $0x68] sm:$0xff]  ;;  %v1657_v51 = vadd.s32 256, %v1637_v41 }
   0x5   :  { %v1165_v12 = vpack.c.bf16 %v335_v10, %v331_v9  ;;  %1164 = vmatprep.subr.bf16.mxu0 %v1163_v7  ;;  %v1293_v16 = vpack.c.bf16 %v337_v14, %v333_v13  ;;  %v342_v18 = vld [vmem:[%s2938_s2 + $0x58] sm:$0xff]  ;;  %v1167_v20 = vpack.c.bf16 %v344_v17, %v340_v15  ;;  %v339_v22 = vld [vmem:[%s2938_s2 + $0x40] sm:$0xff]  ;;  %v341_v24 = vld [vmem:[%s2938_s2 + $0x50] sm:$0xff]  ;;  %1292 = vmatprep.subr.bf16.mxu1 %v1291_v11 }
   0x6   :  { %v346_v19 = vld [vmem:[%s2938_s2 + $0x78] sm:$0xff]  ;;  %76 = vperm.xlu1 %1497, %v1556_v3   ;;  %52 = vperm.xlu0 %1496, %v1556_v3   ;;  %v343_v23 = vld [vmem:[%s2938_s2 + $0x60] sm:$0xff]  ;;  %v345_v26 = vld [vmem:[%s2938_s2 + $0x70] sm:$0xff]  ;;  %v1680_v61 = vand.u32 255, %v1657_v51 }
   0x7   :  { %v1295_v21 = vpack.c.bf16 %v346_v19, %v342_v18  ;;  %1166 = vmatpush1.bf16.msra.mxu0 %v1165_v12  ;;  %v348_v27 = vld [vmem:[%s2938_s2 + $0x88] sm:$0xff]  ;;  %1294 = vmatpush1.bf16.msra.mxu1 %v1293_v16  ;;  %v1169_v29 = vpack.c.bf16 %v343_v23, %v339_v22  ;;  %v1297_v30 = vpack.c.bf16 %v345_v26, %v341_v24  ;;  %v350_v31 = vld [vmem:[%s2938_s2 + $0x98] sm:$0xff]  ;;  %v347_v35 = vld [vmem:[%s2938_s2 + $0x80] sm:$0xff]  ;;  %v1515_v23 = vmov 6  }
   0x8   :  { %v352_v28 = vld [vmem:[%s2938_s2 + $0xa8] sm:$0xff]  ;;  %1168 = vmatprep.subr.bf16.mxu0 %v1167_v20  ;;  %v354_v32 = vld [vmem:[%s2938_s2 + $0xb8] sm:$0xff]  ;;  %v351_v36 = vld [vmem:[%s2938_s2 + $0xa0] sm:$0xff]  ;;  %v61_v13 = vshra.s32 %v1680_v61, 1 }
   0x9   :  { %1296 = vmatprep.subr.bf16.mxu1 %v1295_v21  ;;  %v1171_v33 = vpack.c.bf16 %v352_v28, %v348_v27  ;;  %v1299_v34 = vpack.c.bf16 %v354_v32, %v350_v31  ;;  %v349_v38 = vld [vmem:[%s2938_s2 + $0x90] sm:$0xff]  ;;  %v356_v40 = vld [vmem:[%s2938_s2 + $0xc8] sm:$0xff]  ;;  %v358_v43 = vld [vmem:[%s2938_s2 + $0xd8] sm:$0xff]  ;;  %v1173_v45 = vpack.c.bf16 %v351_v36, %v347_v35  ;;  %v39_v27 = vand.u32 1, %v1680_v61 }
   0xa   :  { %1499 = vset.pattern.permute.xlu1 %v1511_v37  ;;  %1498 = vset.pattern.permute.xlu0 %v1511_v37  ;;  %v353_v39 = vld [vmem:[%s2938_s2 + $0xb0] sm:$0xff]  ;;  %v360_v42 = vld [vmem:[%s2938_s2 + $0xe8] sm:$0xff]  ;;  %v362_v44 = vld [vmem:[%s2938_s2 + $0xf8] sm:$0xff]  ;;  %v1735_v26 = vand.u32 1, %v61_v13 }
   0xb   :  { %108 = vperm.xlu1 %1499, %v1556_v3   ;;  %104 = vperm.xlu0 %1498, %v1551_v2   ;;  %v1301_v46 = vpack.c.bf16 %v353_v39, %v349_v38  ;;  %v1175_v47 = vpack.c.bf16 %v360_v42, %v356_v40  ;;  %v1303_v48 = vpack.c.bf16 %v362_v44, %v358_v43  ;;  %v355_v49 = vld [vmem:[%s2938_s2 + $0xc0] sm:$0xff]  ;;  %v357_v53 = vld [vmem:[%s2938_s2 + $0xd0] sm:$0xff]  ;;  %v364_v55 = vld [vmem:[%s2938_s2 + $0x108] sm:$0xff]  ;;  %vm43_vm6 = vcmp.eq.s32.totalorder %v39_v27, 1 }
   0xc   :  { %1170 = vmatpush1.bf16.msra.mxu0 %v1169_v29  ;;  %1298 = vmatpush1.bf16.msra.mxu1 %v1297_v30  ;;  %v359_v50 = vld [vmem:[%s2938_s2 + $0xe0] sm:$0xff]  ;;  %v361_v54 = vld [vmem:[%s2938_s2 + $0xf0] sm:$0xff]  ;;  %v368_v56 = vld [vmem:[%s2938_s2 + $0x128] sm:$0xff]  ;;  %v93_v29 = vshra.s32 %v1680_v61, 2  ;;  %vm69_vm5 = vcmp.eq.s32.totalorder %v1735_v26, 1 }
   0xd   :  { %1172 = vmatprep.subr.bf16.mxu0 %v1171_v33  ;;  %1300 = vmatprep.subr.bf16.mxu1 %v1299_v34  ;;  %v366_v57 = vld [vmem:[%s2938_s2 + $0x118] sm:$0xff]  ;;  %v1177_v59 = vpack.c.bf16 %v359_v50, %v355_v49  ;;  %v1305_v60 = vpack.c.bf16 %v361_v54, %v357_v53  ;;  %v1179_v62 = vpack.c.bf16 %v368_v56, %v364_v55  ;;  %v363_v0 = vld [vmem:[%s2938_s2 + $0x100] sm:$0xff]  ;;  %v365_v4 = vld [vmem:[%s2938_s2 + $0x110] sm:$0xff]  ;;  %v1516_v55 = vmov 7  }
   0xe   :  { %v370_v58 = vld [vmem:[%s2938_s2 + $0x138] sm:$0xff]  ;;  %v367_v1 = vld [vmem:[%s2938_s2 + $0x120] sm:$0xff]  ;;  %v369_v7 = vld [vmem:[%s2938_s2 + $0x130] sm:$0xff]  ;;  %v89_v34 = vadd.s32 %v1735_v26, %v39_v27  ;;  %v1767_v44 = vand.u32 1, %v93_v29 }
   0xf   :  { %1500 = vset.pattern.permute.xlu1 %v1512_v52  ;;  %1501 = vset.pattern.permute.xlu0 %v1512_v52  ;;  %v1307_v63 = vpack.c.bf16 %v370_v58, %v366_v57  ;;  %v372_v8 = vld [vmem:[%s2938_s2 + $0x148] sm:$0xff]  ;;  %v374_v10 = vld [vmem:[%s2938_s2 + $0x158] sm:$0xff]  ;;  %v1181_v12 = vpack.c.bf16 %v367_v1, %v363_v0  ;;  %v1309_v14 = vpack.c.bf16 %v369_v7, %v365_v4  ;;  %v371_v16 = vld [vmem:[%s2938_s2 + $0x140] sm:$0xff] }
  0x10   :  { %136 = vperm.xlu1 %1500, %v1551_v2   ;;  %140 = vperm.xlu0 %1501, %v1556_v3   ;;  %v376_v9 = vld [vmem:[%s2938_s2 + $0x168] sm:$0xff]  ;;  %v378_v11 = vld [vmem:[%s2938_s2 + $0x178] sm:$0xff]  ;;  %v375_v17 = vld [vmem:[%s2938_s2 + $0x160] sm:$0xff]  ;;  %v121_v49 = vadd.s32 %v1767_v44, %v89_v34  ;;  %vm101_vm7 = vcmp.eq.s32.totalorder %v1767_v44, 1 }
  0x11   :  { %1174 = vmatpush1.bf16.msra.mxu0 %v1173_v45  ;;  %1302 = vmatpush1.bf16.msra.mxu1 %v1301_v46  ;;  %v1183_v15 = vpack.c.bf16 %v376_v9, %v372_v8  ;;  %v373_v18 = vld [vmem:[%s2938_s2 + $0x150] sm:$0xff]  ;;  %v1311_v19 = vpack.c.bf16 %v378_v11, %v374_v10  ;;  %v380_v21 = vld [vmem:[%s2938_s2 + $0x188] sm:$0xff]  ;;  %v382_v24 = vld [vmem:[%s2938_s2 + $0x198] sm:$0xff]  ;;  %v1185_v28 = vpack.c.bf16 %v375_v17, %v371_v16  ;;  %v125_v45 = vshra.s32 %v1680_v61, 3 }
  0x12   :  { %1176 = vmatprep.subr.bf16.mxu0 %v1175_v47  ;;  %1304 = vmatprep.subr.bf16.mxu1 %v1303_v48  ;;  %v377_v20 = vld [vmem:[%s2938_s2 + $0x170] sm:$0xff]  ;;  %v384_v22 = vld [vmem:[%s2938_s2 + $0x1a8] sm:$0xff]  ;;  %v386_v25 = vld [vmem:[%s2938_s2 + $0x1b8] sm:$0xff]  ;;  %v189_v16 = vshra.s32 %v1680_v61, 5 }
  0x13   :  { %v1313_v30 = vpack.c.bf16 %v377_v20, %v373_v18  ;;  %v1187_v31 = vpack.c.bf16 %v384_v22, %v380_v21  ;;  %v379_v32 = vld [vmem:[%s2938_s2 + $0x180] sm:$0xff]  ;;  %v1315_v35 = vpack.c.bf16 %v386_v25, %v382_v24  ;;  %v381_v36 = vld [vmem:[%s2938_s2 + $0x190] sm:$0xff]  ;;  %v388_v38 = vld [vmem:[%s2938_s2 + $0x1c8] sm:$0xff] }
  0x14   :  { %1502 = vset.pattern.permute.xlu1 %v1513_v5  ;;  %1503 = vset.pattern.permute.xlu0 %v1514_v6  ;;  %v383_v33 = vld [vmem:[%s2938_s2 + $0x1a0] sm:$0xff]  ;;  %v385_v37 = vld [vmem:[%s2938_s2 + $0x1b0] sm:$0xff]  ;;  %v392_v39 = vld [vmem:[%s2938_s2 + $0x1e8] sm:$0xff] }
  0x15   :  { %168 = vperm.xlu1 %1502, %v1551_v2   ;;  %200 = vperm.xlu0 %1503, %v1551_v2   ;;  %v390_v40 = vld [vmem:[%s2938_s2 + $0x1d8] sm:$0xff]  ;;  %v1189_v43 = vpack.c.bf16 %v383_v33, %v379_v32  ;;  %v1317_v46 = vpack.c.bf16 %v385_v37, %v381_v36  ;;  %v387_v47 = vld [vmem:[%s2938_s2 + $0x1c0] sm:$0xff]  ;;  %v1191_v50 = vpack.c.bf16 %v392_v39, %v388_v38  ;;  %v389_v53 = vld [vmem:[%s2938_s2 + $0x1d0] sm:$0xff]  ;;  %v221_v32 = vshra.s32 %v1680_v61, 6 }
  0x16   :  { %1178 = vmatpush1.bf16.msra.mxu0 %v1177_v59  ;;  %1306 = vmatpush1.bf16.msra.mxu1 %v1305_v60  ;;  %v394_v42 = vld [vmem:[%s2938_s2 + $0x1f8] sm:$0xff]  ;;  %v391_v48 = vld [vmem:[%s2938_s2 + $0x1e0] sm:$0xff]  ;;  %v393_v54 = vld [vmem:[%s2938_s2 + $0x1f0] sm:$0xff]  ;;  %v1789_v59 = vand.u32 1, %v125_v45 }
  0x17   :  { %1180 = vmatprep.subr.bf16.mxu0 %v1179_v62  ;;  %1308 = vmatprep.subr.bf16.mxu1 %v1307_v63  ;;  %v1319_v52 = vpack.c.bf16 %v394_v42, %v390_v40  ;;  %v396_v56 = vld [vmem:[%s2938_s2 + $0x208] sm:$0xff]  ;;  %v1193_v58 = vpack.c.bf16 %v391_v48, %v387_v47  ;;  %v398_v60 = vld [vmem:[%s2938_s2 + $0x218] sm:$0xff]  ;;  %v157_v63 = vshra.s32 %v1680_v61, 4  ;;  %v1321_v0 = vpack.c.bf16 %v393_v54, %v389_v53  ;;  %v395_v1 = vld [vmem:[%s2938_s2 + $0x200] sm:$0xff] }
  0x18   :  { %v400_v57 = vld [vmem:[%s2938_s2 + $0x228] sm:$0xff]  ;;  %v402_v62 = vld [vmem:[%s2938_s2 + $0x238] sm:$0xff]  ;;  %v399_v4 = vld [vmem:[%s2938_s2 + $0x220] sm:$0xff]  ;;  %v1882_v47 = vand.u32 1, %v221_v32  ;;  %vm133_vm8 = vcmp.eq.s32.totalorder %v1789_v59, 1 }
  0x19   :  { %172 = vperm.xlu1 %1502, %v1556_v3   ;;  %1506 = vset.pattern.permute.xlu0 %v1515_v23  ;;  %v397_v5 = vld [vmem:[%s2938_s2 + $0x210] sm:$0xff]  ;;  %v1195_v7 = vpack.c.bf16 %v400_v57, %v396_v56  ;;  %v404_v9 = vld [vmem:[%s2938_s2 + $0x248] sm:$0xff]  ;;  %v1323_v11 = vpack.c.bf16 %v402_v62, %v398_v60  ;;  %v410_v13 = vld [vmem:[%s2938_s2 + $0x278] sm:$0xff]  ;;  %v253_v60 = vshra.s32 %v1680_v61, 7 }
  0x1a   :  { %236 = vperm.xlu0 %1506, %v1556_v3   ;;  %1182 = vmatpush1.bf16.msra.mxu0 %v1181_v12  ;;  %v401_v8 = vld [vmem:[%s2938_s2 + $0x230] sm:$0xff]  ;;  %v408_v10 = vld [vmem:[%s2938_s2 + $0x268] sm:$0xff]  ;;  %v406_v12 = vld [vmem:[%s2938_s2 + $0x258] sm:$0xff] }
  0x1b   :  { %1310 = vmatpush1.bf16.msra.mxu1 %v1309_v14  ;;  %1184 = vmatprep.subr.bf16.mxu0 %v1183_v15  ;;  %v1197_v14 = vpack.c.bf16 %v399_v4, %v395_v1  ;;  %v1824_v15 = vand.u32 1, %v157_v63  ;;  %v1325_v17 = vpack.c.bf16 %v401_v8, %v397_v5  ;;  %v1199_v18 = vpack.c.bf16 %v408_v10, %v404_v9  ;;  %v407_v20 = vld [vmem:[%s2938_s2 + $0x260] sm:$0xff]  ;;  %v405_v21 = vld [vmem:[%s2938_s2 + $0x250] sm:$0xff]  ;;  %v412_v25 = vld [vmem:[%s2938_s2 + $0x288] sm:$0xff] }
  0x1c   :  { %1312 = vmatprep.subr.bf16.mxu1 %v1311_v19  ;;  %v403_v19 = vld [vmem:[%s2938_s2 + $0x240] sm:$0xff]  ;;  %v1327_v22 = vpack.c.bf16 %v410_v13, %v406_v12  ;;  %v418_v29 = vld [vmem:[%s2938_s2 + $0x2b8] sm:$0xff]  ;;  %v413_v37 = vld [vmem:[%s2938_s2 + $0x290] sm:$0xff]  ;;  %v1916_v5 = vand.u32 1, %v253_v60 }
  0x1d   :  { %1504 = vset.pattern.permute.xlu1 %v1514_v6  ;;  %v153_v6 = vadd.s32 %v1789_v59, %v121_v49  ;;  %v415_v36 = vld [vmem:[%s2938_s2 + $0x2a0] sm:$0xff]  ;;  %v417_v39 = vld [vmem:[%s2938_s2 + $0x2b0] sm:$0xff]  ;;  %v420_v40 = vld [vmem:[%s2938_s2 + $0x2c8] sm:$0xff] }
  0x1e   :  { %204 = vperm.xlu1 %1504, %v1556_v3   ;;  %1186 = vmatpush1.bf16.msra.mxu0 %v1185_v28  ;;  %v416_v28 = vld [vmem:[%s2938_s2 + $0x2a8] sm:$0xff]  ;;  %v426_v45 = vld [vmem:[%s2938_s2 + $0x2f8] sm:$0xff]  ;;  %v1333_v48 = vpack.c.bf16 %v417_v39, %v413_v37  ;;  %v421_v53 = vld [vmem:[%s2938_s2 + $0x2d0] sm:$0xff] }
  0x1f   :  { %1314 = vmatpush1.bf16.msra.mxu1 %v1313_v30  ;;  %1188 = vmatprep.subr.bf16.mxu0 %v1187_v31  ;;  %v185_v24 = vadd.s32 %v1824_v15, %v153_v6  ;;  %v1201_v30 = vpack.c.bf16 %v407_v20, %v403_v19  ;;  %v1853_v31 = vand.u32 1, %v189_v16  ;;  %v1203_v34 = vpack.c.bf16 %v416_v28, %v412_v25  ;;  %v424_v42 = vld [vmem:[%s2938_s2 + $0x2e8] sm:$0xff]  ;;  %v430_v62 = vld [vmem:[%s2938_s2 + $0x318] sm:$0xff]  ;;  %v427_v1 = vld [vmem:[%s2938_s2 + $0x300] sm:$0xff] }
  0x20   :  { %1316 = vmatprep.subr.bf16.mxu1 %v1315_v35  ;;  %1508 = vset.pattern.permute.xlu0 %v1516_v55  ;;  %v411_v35 = vld [vmem:[%s2938_s2 + $0x280] sm:$0xff]  ;;  %v1207_v49 = vpack.c.bf16 %v424_v42, %v420_v40  ;;  %v428_v56 = vld [vmem:[%s2938_s2 + $0x308] sm:$0xff]  ;;  %v434_v63 = vld [vmem:[%s2938_s2 + $0x338] sm:$0xff] }
  0x21   :  { %v432_v57 = vld [vmem:[%s2938_s2 + $0x328] sm:$0xff]  ;;  %v431_v4 = vld [vmem:[%s2938_s2 + $0x320] sm:$0xff]  ;;  %v429_v8 = vld [vmem:[%s2938_s2 + $0x310] sm:$0xff]  ;;  %v1339_v12 = vpack.c.bf16 %v434_v63, %v430_v62 }
  0x22   :  { %1505 = vset.pattern.permute.xlu1 %v1515_v23  ;;  %1190 = vmatpush1.bf16.msra.mxu0 %v1189_v43  ;;  %v409_v23 = vld [vmem:[%s2938_s2 + $0x270] sm:$0xff]  ;;  %v217_v43 = vadd.s32 %v1853_v31, %v185_v24  ;;  %v436_v10 = vld [vmem:[%s2938_s2 + $0x348] sm:$0xff]  ;;  %v442_v16 = vld [vmem:[%s2938_s2 + $0x378] sm:$0xff] }
  0x23   :  { %232 = vperm.xlu1 %1505, %v1551_v2   ;;  %1318 = vmatpush1.bf16.msra.mxu1 %v1317_v46  ;;  %v1329_v33 = vpack.c.bf16 %v409_v23, %v405_v21  ;;  %v1205_v46 = vpack.c.bf16 %v415_v36, %v411_v35  ;;  %v433_v9 = vld [vmem:[%s2938_s2 + $0x330] sm:$0xff]  ;;  %v440_v13 = vld [vmem:[%s2938_s2 + $0x368] sm:$0xff]  ;;  %v439_v23 = vld [vmem:[%s2938_s2 + $0x360] sm:$0xff] }
  0x24   :  { %1192 = vmatprep.subr.bf16.mxu0 %v1191_v50  ;;  %1320 = vmatprep.subr.bf16.mxu1 %v1319_v52  ;;  %v419_v50 = vld [vmem:[%s2938_s2 + $0x2c0] sm:$0xff]  ;;  %v1341_v20 = vpack.c.bf16 %v433_v9, %v429_v8  ;;  %v1215_v21 = vpack.c.bf16 %v440_v13, %v436_v10  ;;  %v437_v24 = vld [vmem:[%s2938_s2 + $0x350] sm:$0xff]  ;;  %v450_v32 = vld [vmem:[%s2938_s2 + $0x3b8] sm:$0xff]  ;;  %v2031_v13 = vand.u32 255, %v1637_v41 }
  0x25   :  { %v423_v52 = vld [vmem:[%s2938_s2 + $0x2e0] sm:$0xff]  ;;  %v441_v25 = vld [vmem:[%s2938_s2 + $0x370] sm:$0xff] }
  0x26   :  { %1194 = vmatpush1.bf16.msra.mxu0 %v1193_v58  ;;  %v249_v58 = vadd.s32 %v1882_v47, %v217_v43  ;;  %v1345_v39 = vpack.c.bf16 %v441_v25, %v437_v24  ;;  %v443_v42 = vld [vmem:[%s2938_s2 + $0x380] sm:$0xff]  ;;  %v453_v60 = vld [vmem:[%s2938_s2 + $0x3d0] sm:$0xff]  ;;  %v91_v24 = vshra.s32 %v2031_v13, 2 }
  0x27   :  { %1507 = vset.pattern.permute.xlu1 %v1516_v55  ;;  %1322 = vmatpush1.bf16.msra.mxu1 %v1321_v0  ;;  %v425_v55 = vld [vmem:[%s2938_s2 + $0x2f0] sm:$0xff]  ;;  %v1209_v0 = vpack.c.bf16 %v423_v52, %v419_v50  ;;  %v447_v43 = vld [vmem:[%s2938_s2 + $0x3a0] sm:$0xff]  ;;  %v456_v50 = vld [vmem:[%s2938_s2 + $0x3e8] sm:$0xff] }
  0x28   :  { %264 = vperm.xlu1 %1507, %v1551_v2   ;;  %1196 = vmatprep.subr.bf16.mxu0 %v1195_v7  ;;  %v414_v2 = vld [vmem:[%s2938_s2 + $0x298] sm:$0xff]  ;;  %v1337_v6 = vpack.c.bf16 %v425_v55, %v421_v53  ;;  %v1211_v7 = vpack.c.bf16 %v432_v57, %v428_v56  ;;  %v451_v57 = vld [vmem:[%s2938_s2 + $0x3c0] sm:$0xff]  ;;  %v457_v63 = vld [vmem:[%s2938_s2 + $0x3f0] sm:$0xff] }
  0x29   :  { %1324 = vmatprep.subr.bf16.mxu1 %v1323_v11  ;;  %v1331_v38 = vpack.c.bf16 %v418_v29, %v414_v2  ;;  %v35_v11 = vshra.s32 %v1657_v51, 8  ;;  %v435_v51 = vld [vmem:[%s2938_s2 + $0x340] sm:$0xff]  ;;  %v444_v2 = vld [vmem:[%s2938_s2 + $0x388] sm:$0xff]  ;;  %v454_v52 = vld [vmem:[%s2938_s2 + $0x3d8] sm:$0xff]  ;;  %v1353_v8 = vpack.c.bf16 %v457_v63, %v453_v60 }
  0x2a   :  { %1198 = vmatpush1.bf16.msra.mxu0 %v1197_v14  ;;  %v438_v14 = vld [vmem:[%s2938_s2 + $0x358] sm:$0xff]  ;;  %v448_v29 = vld [vmem:[%s2938_s2 + $0x3a8] sm:$0xff]  ;;  %v1217_v36 = vpack.c.bf16 %v439_v23, %v435_v51  ;;  %v37_v23 = vand.u32 1, %v2031_v13  ;;  %v469_v28 = vld [vmem:[%s2938_s2 + $0x450] sm:$0xff] }
  0x2b   :  { %1326 = vmatpush1.bf16.msra.mxu1 %v1325_v17  ;;  %1200 = vmatprep.subr.bf16.mxu0 %v1199_v18  ;;  %v281_v17 = vadd.s32 %v1916_v5, %v249_v58  ;;  %v1213_v18 = vpack.c.bf16 %v431_v4, %v427_v1  ;;  %vm1950_vm0 = vcmp.eq.s32.totalorder %v35_v11, 0  ;;  %v1219_v40 = vpack.c.bf16 %v448_v29, %v444_v2  ;;  %v458_v53 = vld [vmem:[%s2938_s2 + $0x3f8] sm:$0xff]  ;;  %v455_v58 = vld [vmem:[%s2938_s2 + $0x3e0] sm:$0xff]  ;;  %v464_v1 = vld [vmem:[%s2938_s2 + $0x428] sm:$0xff] }
  0x2c   :  { %268 = vperm.xlu1 %1507, %v1556_v3   ;;  %1328 = vmatprep.subr.bf16.mxu1 %v1327_v22  ;;  %v422_v3 = vld [vmem:[%s2938_s2 + $0x2d8] sm:$0xff]  ;;  %v1343_v22 = vpack.c.bf16 %v442_v16, %v438_v14  ;;  %v1351_v62 = vpack.c.bf16 %v458_v53, %v454_v52  ;;  %v2025_v11 = vadd.s32 128, %v1637_v41  ;;  %v2035_v16 = vadd.s32 384, %v1637_v41 }
  0x2d   :  { %v1335_v54 = vpack.c.bf16 %v426_v45, %v422_v3  ;;  %v285_v19 = vand.u32 3, %v281_v17  ;;  %v445_v3 = vld [vmem:[%s2938_s2 + $0x390] sm:$0xff]  ;;  %v462_v4 = vld [vmem:[%s2938_s2 + $0x418] sm:$0xff]  ;;  %v59_v17 = vshra.s32 %v2031_v13, 1  ;;  %vm2167_vm12 = vcmp.eq.s32.totalorder %v37_v23, 1 }
  0x2e   :  { %1202 = vmatpush1.bf16.msra.mxu0 %v1201_v30  ;;  %v446_v30 = vld [vmem:[%s2938_s2 + $0x398] sm:$0xff] }
  0x2f   :  { %1330 = vmatpush1.bf16.msra.mxu1 %v1329_v33  ;;  %1204 = vmatprep.subr.bf16.mxu0 %v1203_v34  ;;  %vm289_vm1 = vcmp.eq.s32.totalorder %v285_v19, 0  ;;  %vm293_vm2 = vcmp.eq.s32.totalorder %v285_v19, 2  ;;  %vm305_vm3 = vcmp.eq.s32.totalorder %v285_v19, 1  ;;  %vm309_vm4 = vcmp.eq.s32.totalorder %v285_v19, 3 }
  0x30   :  { %1332 = vmatprep.subr.bf16.mxu1 %v1331_v38  ;;  %v1517_v33 = vmov 0.0  }
  0x31   :  { %v297_v34 = vsel %vm293_vm2, -1.0, %v1517_v33  ;;  %v313_v35 = vsel %vm309_vm4, 1.0, %v1517_v33  ;;  %vm165_vm2 = vcmp.eq.s32.totalorder %v1824_v15, 1 }
  0x32   :  { %1206 = vmatpush1.bf16.msra.mxu0 %v1205_v46  ;;  %v1968_v37 = vsel %vm289_vm1, 1.0, %v297_v34  ;;  %v1970_v38 = vsel %vm305_vm3, -1.0, %v313_v35  ;;  %v1347_v46 = vpack.c.bf16 %v450_v32, %v446_v30  ;;  %v2060_v34 = vand.u32 1, %v91_v24 }
  0x33   :  { %1334 = vmatpush1.bf16.msra.mxu1 %v1333_v48  ;;  %1208 = vmatprep.subr.bf16.mxu0 %v1207_v49  ;;  %v325_v45 = vsel %vm1950_vm0, %v1968_v37, %v1970_v38  ;;  %v449_v48 = vld [vmem:[%s2938_s2 + $0x3b0] sm:$0xff]  ;;  %v452_v49 = vld [vmem:[%s2938_s2 + $0x3c8] sm:$0xff]  ;;  %v123_v35 = vshra.s32 %v2031_v13, 3  ;;  %vm1086_vm0 = vcmask 7168  }
  0x34   :  { %1336 = vmatprep.subr.bf16.mxu1 %v1335_v54  ;;  %v1221_v54 = vpack.c.bf16 %v447_v43, %v443_v42  ;;  %v1349_v55 = vpack.c.bf16 %v449_v48, %v445_v3  ;;  %v1223_v56 = vpack.c.bf16 %v456_v50, %v452_v49  ;;  %v155_v50 = vshra.s32 %v2031_v13, 4  ;;  %v473_v37 = vld [vmem:[%s2938_s2 + $0x470] sm:$0xff]  ;;  %v476_v38 = vld [vmem:[%s2938_s2 + $0x488] sm:$0xff] }
  0x35   :  { %v2075_v49 = vand.u32 1, %v123_v35  ;;  %v251_v35 = vshra.s32 %v2031_v13, 7 }
  0x36   :  { %1210 = vmatpush1.bf16.msra.mxu0 %v1209_v0  ;;  %v460_v0 = vld [vmem:[%s2938_s2 + $0x408] sm:$0xff]  ;;  %v2092_v63 = vand.u32 1, %v155_v50 }
  0x37   :  { %1338 = vmatpush1.bf16.msra.mxu1 %v1337_v6  ;;  %1212 = vmatprep.subr.bf16.mxu0 %v1211_v7  ;;  %v466_v6 = vld [vmem:[%s2938_s2 + $0x438] sm:$0xff]  ;;  %v1225_v7 = vpack.c.bf16 %v455_v58, %v451_v57  ;;  %v1227_v9 = vpack.c.bf16 %v464_v1, %v460_v0  ;;  %v187_v0 = vshra.s32 %v2031_v13, 5 }
  0x38   :  { %1340 = vmatprep.subr.bf16.mxu1 %v1339_v12  ;;  %v1355_v10 = vpack.c.bf16 %v466_v6, %v462_v4  ;;  %v2028_v12 = vand.u32 255, %v2025_v11 }
  0x3a   :  { %1214 = vmatpush1.bf16.msra.mxu0 %v1213_v18  ;;  %v60_v14 = vshra.s32 %v2028_v12, 1  ;;  %v38_v51 = vand.u32 1, %v2028_v12  ;;  %v92_v19 = vshra.s32 %v2028_v12, 2  ;;  %v124_v2 = vshra.s32 %v2028_v12, 3 }
  0x3b   :  { %1342 = vmatpush1.bf16.msra.mxu1 %v1341_v20  ;;  %1216 = vmatprep.subr.bf16.mxu0 %v1215_v21  ;;  %v2043_v20 = vand.u32 255, %v2035_v16  ;;  %v188_v53 = vshra.s32 %v2028_v12, 5  ;;  %v220_v4 = vshra.s32 %v2028_v12, 6  ;;  %v252_v27 = vshra.s32 %v2028_v12, 7 }
  0x3c   :  { %1344 = vmatprep.subr.bf16.mxu1 %v1343_v22  ;;  %v2038_v18 = vand.u32 1, %v60_v14  ;;  %v2048_v22 = vand.u32 1, %v59_v17  ;;  %v2052_v25 = vand.u32 1, %v92_v19  ;;  %v2115_v19 = vand.u32 1, %v187_v0 }
  0x3d   :  { %v62_v29 = vshra.s32 %v2043_v20, 1  ;;  %v40_v42 = vand.u32 1, %v2043_v20  ;;  %v94_v43 = vshra.s32 %v2043_v20, 2  ;;  %v126_v57 = vshra.s32 %v2043_v20, 3 }
  0x3e   :  { %1218 = vmatpush1.bf16.msra.mxu0 %v1217_v36  ;;  %v88_v21 = vadd.s32 %v2038_v18, %v38_v51  ;;  %v87_v30 = vadd.s32 %v2048_v22, %v37_v23  ;;  %v2063_v36 = vand.u32 1, %v124_v2  ;;  %v2097_v1 = vand.u32 1, %v188_v53 }
  0x3f   :  { %1346 = vmatpush1.bf16.msra.mxu1 %v1345_v39  ;;  %1220 = vmatprep.subr.bf16.mxu0 %v1219_v40  ;;  %v156_v39 = vshra.s32 %v2028_v12, 4  ;;  %v2066_v40 = vand.u32 1, %v62_v29  ;;  %v158_v26 = vshra.s32 %v2043_v20, 4  ;;  %v2119_v2 = vand.u32 1, %v220_v4 }
  0x40   :  { %1348 = vmatprep.subr.bf16.mxu1 %v1347_v46  ;;  %v120_v32 = vadd.s32 %v2052_v25, %v88_v21  ;;  %v119_v3 = vadd.s32 %v2060_v34, %v87_v30  ;;  %v219_v21 = vshra.s32 %v2031_v13, 6  ;;  %v190_v30 = vshra.s32 %v2043_v20, 5 }
  0x41   :  { %v90_v48 = vadd.s32 %v2066_v40, %v40_v42  ;;  %v2078_v52 = vand.u32 1, %v156_v39  ;;  %v2121_v29 = vand.u32 1, %v158_v26  ;;  %vm67_vm9 = vcmp.eq.s32.totalorder %v2048_v22, 1 }
  0x42   :  { %1222 = vmatpush1.bf16.msra.mxu0 %v1221_v54  ;;  %v152_v46 = vadd.s32 %v2063_v36, %v120_v32  ;;  %v151_v58 = vadd.s32 %v2075_v49, %v119_v3  ;;  %v2136_v50 = vand.u32 1, %v219_v21  ;;  %vm2173_vm13 = vcmp.eq.s32.totalorder %v38_v51, 1 }
  0x43   :  { %1350 = vmatpush1.bf16.msra.mxu1 %v1349_v55  ;;  %1224 = vmatprep.subr.bf16.mxu0 %v1223_v56  ;;  %v2085_v56 = vand.u32 1, %v94_v43  ;;  %vm2179_vm14 = vcmp.eq.s32.totalorder %v40_v42, 1  ;;  %vm195_vm10 = vcmp.eq.s32.totalorder %v2115_v19, 1  ;;  %vm196_vm4 = vcmp.eq.s32.totalorder %v2097_v1, 1 }
  0x44   :  { %1352 = vmatprep.subr.bf16.mxu1 %v1351_v62  ;;  %v184_v60 = vadd.s32 %v2078_v52, %v152_v46  ;;  %v2131_v46 = vand.u32 1, %v252_v27 }
  0x45   :  { %v122_v62 = vadd.s32 %v2085_v56, %v90_v48 }
  0x46   :  { %1226 = vmatpush1.bf16.msra.mxu0 %v1225_v7  ;;  %v216_v61 = vadd.s32 %v2097_v1, %v184_v60 }
  0x47   :  { %1354 = vmatpush1.bf16.msra.mxu1 %v1353_v8  ;;  %1228 = vmatprep.subr.bf16.mxu0 %v1227_v9  ;;  %v2104_v8 = vand.u32 1, %v126_v57  ;;  %v183_v9 = vadd.s32 %v2092_v63, %v151_v58  ;;  %v2139_v57 = vand.u32 1, %v190_v30  ;;  %v222_v58 = vshra.s32 %v2043_v20, 6 }
  0x48   :  { %1356 = vmatprep.subr.bf16.mxu1 %v1355_v10  ;;  %v248_v3 = vadd.s32 %v2119_v2, %v216_v61 }
  0x49   :  { %v154_v17 = vadd.s32 %v2104_v8, %v122_v62  ;;  %v215_v32 = vadd.s32 %v2115_v19, %v183_v9  ;;  %v2143_v62 = vand.u32 1, %v251_v35  ;;  %v2154_v27 = vand.u32 1, %v222_v58 }
  0x4a   :  { %v280_v0 = vadd.s32 %v2131_v46, %v248_v3  ;;  %v33_v58 = vshra.s32 %v1637_v41, 8  ;;  %v36_v3 = vshra.s32 %v2035_v16, 8 }
  0x4b   :  { %v186_v48 = vadd.s32 %v2121_v29, %v154_v17  ;;  %v247_v60 = vadd.s32 %v2136_v50, %v215_v32  ;;  %vm230_vm1 = vcmp.eq.s32.totalorder %v2154_v27, 1 }
  0x4c   :  { %v284_v17 = vand.u32 3, %v280_v0 }
  0x4d   :  { %v218_v9 = vadd.s32 %v2139_v57, %v186_v48 }
  0x4e   :  { %vm292_vm3 = vcmp.eq.s32.totalorder %v284_v17, 2  ;;  %vm288_vm11 = vcmp.eq.s32.totalorder %v284_v17, 0  ;;  %vm304_vm15 = vcmp.eq.s32.totalorder %v284_v17, 1 }
  0x4f   :  { %v250_v21 = vadd.s32 %v2154_v27, %v218_v9  ;;  %v296_v51 = vsel %vm292_vm3, -1.0, %v1517_v33  ;;  %v491_v27 = vld [vmem:[%s2938_s2 + $0x500] sm:$0xff] }
  0x81   :  { %v2081_v54 = vpop.permute.xlu1 %72  ;;  %v2083_v55 = vpop.permute.xlu0 %47 }
  0x85   :  { %v2100_v6 = vpop.permute.xlu1 %76  ;;  %v2102_v7 = vpop.permute.xlu0 %52 }
  0x86   :  { %v81_v10 = vsel %vm69_vm5, %v2081_v54, %v2100_v6  ;;  %v57_v14 = vsel %vm43_vm6, %v2083_v55, %v2102_v7  ;;  %vm308_vm6 = vcmp.eq.s32.totalorder %v284_v17, 3 }
  0x87   :  { %v85_v24 = vmul.f32 %v81_v10, %v57_v14  ;;  %v254_v10 = vshra.s32 %v2043_v20, 7  ;;  %v279_v14 = vadd.s32 %v2143_v62, %v247_v60  ;;  %v312_v42 = vsel %vm308_vm6, 1.0, %v1517_v33 }
  0x88   :  { %v2213_v60 = vsel %vm288_vm11, 1.0, %v296_v51  ;;  %vm2950_vm6 = vcmp.eq.s32.totalorder %v2038_v18, 1  ;;  %vm2951_vm11 = vcmp.eq.s32.totalorder %v2066_v40, 1  ;;  %v2234_v22 = vsel %vm304_vm15, -1.0, %v312_v42 }
  0x89   :  { %v80_v41 = vsel %vm2950_vm6, %v2081_v54, %v2100_v6  ;;  %v55_v18 = vsel %vm2167_vm12, %v2083_v55, %v2102_v7  ;;  %v56_v40 = vsel %vm2173_vm13, %v2083_v55, %v2102_v7  ;;  %vm2261_vm12 = vcmp.eq.s32.totalorder %v33_v58, 0 }
  0x8a   :  { %v2126_v39 = vpop.permute.xlu1 %108  ;;  %v2128_v43 = vpop.permute.xlu0 %104  ;;  %vm2957_vm13 = vcmp.eq.s32.totalorder %v2060_v34, 1  ;;  %vm260_vm6 = vcmp.eq.s32.totalorder %v2131_v46, 1  ;;  %v472_v46 = vld [vmem:[%s2938_s2 + $0x468] sm:$0xff] }
  0x8b   :  { %v113_v44 = vsel %vm101_vm7, %v2128_v43, %v2126_v39 }
  0x8c   :  { %v117_v53 = vmul.f32 %v113_v44, %v85_v24  ;;  %v2158_v24 = vand.u32 1, %v254_v10  ;;  %v283_v44 = vand.u32 3, %v279_v14  ;;  %v79_v10 = vsel %vm67_vm9, %v2081_v54, %v2100_v6 }
  0x8d   :  { %vm2952_vm9 = vcmp.eq.s32.totalorder %v1853_v31, 1  ;;  %v111_v31 = vsel %vm2957_vm13, %v2128_v43, %v2126_v39  ;;  %vm2960_vm13 = vcmp.eq.s32.totalorder %v2075_v49, 1 }
  0x8e   :  { %v282_v12 = vadd.s32 %v2158_v24, %v250_v21  ;;  %vm291_vm5 = vcmp.eq.s32.totalorder %v283_v44, 2  ;;  %vm307_vm7 = vcmp.eq.s32.totalorder %v283_v44, 3  ;;  %vm303_vm3 = vcmp.eq.s32.totalorder %v283_v44, 1 }
  0x8f   :  { %v2146_v4 = vpop.permute.xlu1 %136  ;;  %v2148_v26 = vpop.permute.xlu0 %140  ;;  %v295_v0 = vsel %vm291_vm5, -1.0, %v1517_v33  ;;  %v311_v9 = vsel %vm307_vm7, 1.0, %v1517_v33  ;;  %vm227_vm5 = vcmp.eq.s32.totalorder %v2136_v50, 1  ;;  %vm228_vm7 = vcmp.eq.s32.totalorder %v2119_v2, 1  ;;  %v459_v50 = vld [vmem:[%s2938_s2 + $0x400] sm:$0xff] }
  0x90   :  { %v145_v59 = vsel %vm133_vm8, %v2146_v4, %v2148_v26  ;;  %vm229_vm8 = vcmp.eq.s32.totalorder %v1882_v47, 1  ;;  %v2208_v48 = vand.u32 3, %v282_v12  ;;  %v2259_v21 = vsel %vm303_vm3, -1.0, %v311_v9 }
  0x91   :  { %v149_v61 = vmul.f32 %v145_v59, %v117_v53  ;;  %v34_v53 = vshra.s32 %v2025_v11, 8  ;;  %v82_v11 = vsel %vm2951_vm11, %v2081_v54, %v2100_v6  ;;  %v58_v54 = vsel %vm2179_vm14, %v2083_v55, %v2102_v7 }
  0x92   :  { %vm2958_vm14 = vcmp.eq.s32.totalorder %v2052_v25, 1  ;;  %v84_v12 = vmul.f32 %v80_v41, %v56_v40  ;;  %vm259_vm3 = vcmp.eq.s32.totalorder %v2143_v62, 1  ;;  %v143_v25 = vsel %vm2960_vm13, %v2146_v4, %v2148_v26 }
  0x93   :  { %vm2251_vm15 = vcmp.eq.s32.totalorder %v34_v53, 0  ;;  %v112_v55 = vsel %vm2958_vm14, %v2128_v43, %v2126_v39  ;;  %vm2961_vm14 = vcmp.eq.s32.totalorder %v2063_v36, 1  ;;  %vm294_vm11 = vcmp.eq.s32.totalorder %v2208_v48, 2 }
  0x94   :  { %v2163_v30 = vpop.permute.xlu1 %168  ;;  %v2200_v23 = vpop.permute.xlu0 %200  ;;  %v144_v16 = vsel %vm2961_vm14, %v2146_v4, %v2148_v26  ;;  %vm2963_vm13 = vcmp.eq.s32.totalorder %v2092_v63, 1  ;;  %vm2964_vm14 = vcmp.eq.s32.totalorder %v2078_v52, 1 }
  0x98   :  { %v2191_v13 = vpop.permute.xlu1 %172 }
  0x99   :  { %v177_v15 = vsel %vm165_vm2, %v2163_v30, %v2191_v13  ;;  %vm287_vm2 = vcmp.eq.s32.totalorder %v283_v44, 0  ;;  %v237_v35 = vpop.permute.xlu0 %236  ;;  %v83_v44 = vmul.f32 %v79_v10, %v55_v18  ;;  %v175_v36 = vsel %vm2963_vm13, %v2163_v30, %v2191_v13 }
  0x9a   :  { %v181_v20 = vmul.f32 %v177_v15, %v149_v61  ;;  %v2256_v17 = vsel %vm287_vm2, 1.0, %v295_v0  ;;  %vm2959_vm2 = vcmp.eq.s32.totalorder %v2085_v56, 1  ;;  %v86_v15 = vmul.f32 %v82_v11, %v58_v54  ;;  %v461_v54 = vld [vmem:[%s2938_s2 + $0x410] sm:$0xff] }
  0x9b   :  { %v114_v7 = vsel %vm2959_vm2, %v2128_v43, %v2126_v39  ;;  %vm2962_vm2 = vcmp.eq.s32.totalorder %v2104_v8, 1  ;;  %v115_v39 = vmul.f32 %v111_v31, %v83_v44  ;;  %v116_v43 = vmul.f32 %v112_v55, %v84_v12 }
  0x9c   :  { %v146_v34 = vsel %vm2962_vm2, %v2146_v4, %v2148_v26  ;;  %v118_v51 = vmul.f32 %v114_v7, %v86_v15  ;;  %v176_v8 = vsel %vm2964_vm14, %v2163_v30, %v2191_v13  ;;  %vm2965_vm2 = vcmp.eq.s32.totalorder %v2121_v29, 1 }
  0x9d   :  { %v205_v59 = vpop.permute.xlu1 %204  ;;  %v178_v4 = vsel %vm2965_vm2, %v2163_v30, %v2191_v13  ;;  %v148_v42 = vmul.f32 %v144_v16, %v116_v43  ;;  %vm2966_vm13 = vcmp.eq.s32.totalorder %v2139_v57, 1  ;;  %vm306_vm14 = vcmp.eq.s32.totalorder %v2208_v48, 1  ;;  %v467_v16 = vld [vmem:[%s2938_s2 + $0x440] sm:$0xff]  ;;  %v478_v43 = vld [vmem:[%s2938_s2 + $0x498] sm:$0xff] }
  0x9e   :  { %v209_v6 = vsel %vm2952_vm9, %v2200_v23, %v205_v59  ;;  %vm290_vm9 = vcmp.eq.s32.totalorder %v2208_v48, 0  ;;  %v150_v47 = vmul.f32 %v146_v34, %v118_v51  ;;  %v207_v63 = vsel %vm195_vm10, %v2200_v23, %v205_v59  ;;  %v471_v34 = vld [vmem:[%s2938_s2 + $0x460] sm:$0xff]  ;;  %v482_v51 = vld [vmem:[%s2938_s2 + $0x4b8] sm:$0xff] }
  0x9f   :  { %v213_v61 = vmul.f32 %v209_v6, %v181_v20  ;;  %v147_v20 = vmul.f32 %v143_v25, %v115_v39  ;;  %v208_v52 = vsel %vm196_vm4, %v2200_v23, %v205_v59  ;;  %v210_v53 = vsel %vm2966_vm13, %v2200_v23, %v205_v59  ;;  %v465_v6 = vld [vmem:[%s2938_s2 + $0x430] sm:$0xff]  ;;  %v480_v39 = vld [vmem:[%s2938_s2 + $0x4a8] sm:$0xff] }
  0xa0   :  { %v180_v30 = vmul.f32 %v176_v8, %v148_v42  ;;  %v182_v13 = vmul.f32 %v178_v4, %v150_v47  ;;  %v298_v0 = vsel %vm294_vm11, -1.0, %v1517_v33  ;;  %vm262_vm10 = vcmp.eq.s32.totalorder %v2158_v24, 1  ;;  %v474_v24 = vld [vmem:[%s2938_s2 + $0x478] sm:$0xff]  ;;  %v475_v4 = vld [vmem:[%s2938_s2 + $0x480] sm:$0xff]  ;;  %v477_v47 = vld [vmem:[%s2938_s2 + $0x490] sm:$0xff] }
  0xa1   :  { %v179_v29 = vmul.f32 %v175_v36, %v147_v20  ;;  %v324_v11 = vsel %vm2251_vm15, %v2213_v60, %v2234_v22  ;;  %v323_v2 = vsel %vm2261_vm12, %v2256_v17, %v2259_v21  ;;  %v463_v22 = vld [vmem:[%s2938_s2 + $0x420] sm:$0xff]  ;;  %vm2969_vm4 = vcmp.eq.s32.totalorder %v1916_v5, 1  ;;  %v470_v5 = vld [vmem:[%s2938_s2 + $0x458] sm:$0xff] }
  0xa2   :  { %v233_v56 = vpop.permute.xlu1 %232  ;;  %v212_v10 = vmul.f32 %v208_v52, %v180_v30  ;;  %v214_v41 = vmul.f32 %v210_v53, %v182_v13  ;;  %v1357_v62 = vpack.c.bf16 %v465_v6, %v461_v54  ;;  %v1233_v36 = vpack.c.bf16 %v471_v34, %v467_v16  ;;  %v484_v52 = vld [vmem:[%s2938_s2 + $0x4c8] sm:$0xff]  ;;  %v490_v30 = vld [vmem:[%s2938_s2 + $0x4f8] sm:$0xff] }
  0xa3   :  { %v241_v49 = vsel %vm229_vm8, %v233_v56, %v237_v35  ;;  %vm310_vm8 = vcmp.eq.s32.totalorder %v2208_v48, 3  ;;  %v239_v19 = vsel %vm227_vm5, %v233_v56, %v237_v35  ;;  %v240_v1 = vsel %vm228_vm7, %v233_v56, %v237_v35  ;;  %v468_v48 = vld [vmem:[%s2938_s2 + $0x448] sm:$0xff] }
  0xa4   :  { %v245_v26 = vmul.f32 %v241_v49, %v213_v61  ;;  %v242_v57 = vsel %vm230_vm1, %v233_v56, %v237_v35  ;;  %v314_v23 = vsel %vm310_vm8, 1.0, %v1517_v33  ;;  %v211_v9 = vmul.f32 %v207_v63, %v179_v29  ;;  %v481_v63 = vld [vmem:[%s2938_s2 + $0x4b0] sm:$0xff]  ;;  %v488_v53 = vld [vmem:[%s2938_s2 + $0x4e8] sm:$0xff]  ;;  %v486_v29 = vld [vmem:[%s2938_s2 + $0x4d8] sm:$0xff] }
  0xa5   :  { %v302_v33 = vsel %vm290_vm9, 1.0, %v298_v0  ;;  %vm2344_vm1 = vcmp.eq.s32.totalorder %v36_v3, 0  ;;  %v244_v18 = vmul.f32 %v240_v1, %v212_v10  ;;  %v246_v40 = vmul.f32 %v242_v57, %v214_v41  ;;  %v483_v0 = vld [vmem:[%s2938_s2 + $0x4c0] sm:$0xff]  ;;  %v492_v10 = vld [vmem:[%s2938_s2 + $0x508] sm:$0xff] }
  0xa6   :  { %v243_v59 = vmul.f32 %v239_v19, %v211_v9  ;;  %v318_v61 = vsel %vm306_vm14, -1.0, %v314_v23  ;;  %v1229_v3 = vpack.c.bf16 %v463_v22, %v459_v50  ;;  %v1359_v56 = vpack.c.bf16 %v474_v24, %v470_v5  ;;  %v487_v19 = vld [vmem:[%s2938_s2 + $0x4e0] sm:$0xff]  ;;  %v485_v23 = vld [vmem:[%s2938_s2 + $0x4d0] sm:$0xff]  ;;  %v496_v41 = vld [vmem:[%s2938_s2 + $0x528] sm:$0xff] }
  0xa7   :  { %v265_v58 = vpop.permute.xlu1 %264  ;;  %v326_v25 = vsel %vm2344_vm1, %v302_v33, %v318_v61  ;;  %v1361_v8 = vpack.c.bf16 %v473_v37, %v469_v28  ;;  %v1235_v20 = vpack.c.bf16 %v480_v39, %v476_v38  ;;  %v1363_v42 = vpack.c.bf16 %v482_v51, %v478_v43  ;;  %v489_v9 = vld [vmem:[%s2938_s2 + $0x4f0] sm:$0xff]  ;;  %v500_v54 = vld [vmem:[%s2938_s2 + $0x548] sm:$0xff]  ;;  %v502_v61 = vld [vmem:[%s2938_s2 + $0x558] sm:$0xff] }
  0xa8   :  { %v1239_v1 = vpack.c.bf16 %v488_v53, %v484_v52  ;;  %v1367_v57 = vpack.c.bf16 %v490_v30, %v486_v29  ;;  %v1241_v50 = vpack.c.bf16 %v487_v19, %v483_v0  ;;  %v1369_v33 = vpack.c.bf16 %v489_v9, %v485_v23  ;;  %v497_v22 = vld [vmem:[%s2938_s2 + $0x530] sm:$0xff]  ;;  %v504_v6 = vld [vmem:[%s2938_s2 + $0x568] sm:$0xff]  ;;  %v514_v5 = vld [vmem:[%s2938_s2 + $0x5b8] sm:$0xff] }
  0xa9   :  { %v509_v28 = vld [vmem:[%s2938_s2 + $0x590] sm:$0xff]  ;;  %v516_v38 = vld [vmem:[%s2938_s2 + $0x5c8] sm:$0xff]  ;;  %v522_v39 = vld [vmem:[%s2938_s2 + $0x5f8] sm:$0xff] }
  0xaa   :  { %v513_v37 = vld [vmem:[%s2938_s2 + $0x5b0] sm:$0xff]  ;;  %v530_v52 = vld [vmem:[%s2938_s2 + $0x638] sm:$0xff]  ;;  %v523_v30 = vld [vmem:[%s2938_s2 + $0x600] sm:$0xff] }
  0xab   :  { %v269_v60 = vpop.permute.xlu1 %268  ;;  %v1381_v51 = vpack.c.bf16 %v513_v37, %v509_v28  ;;  %v525_v19 = vld [vmem:[%s2938_s2 + $0x610] sm:$0xff]  ;;  %v536_v23 = vld [vmem:[%s2938_s2 + $0x668] sm:$0xff]  ;;  %v534_v9 = vld [vmem:[%s2938_s2 + $0x658] sm:$0xff] }
  0xac   :  { %v271_v14 = vsel %vm259_vm3, %v265_v58, %v269_v60  ;;  %v272_v17 = vsel %vm260_vm6, %v265_v58, %v269_v60  ;;  %v273_v21 = vsel %vm2969_vm4, %v265_v58, %v269_v60  ;;  %v274_v32 = vsel %vm262_vm10, %v265_v58, %v269_v60  ;;  %v493_v60 = vld [vmem:[%s2938_s2 + $0x510] sm:$0xff]  ;;  %v560_v28 = vld [vmem:[%s2938_s2 + $0x728] sm:$0xff]  ;;  %v558_v37 = vld [vmem:[%s2938_s2 + $0x718] sm:$0xff] }
  0xad   :  { %v275_v31 = vmul.f32 %v271_v14, %v243_v59  ;;  %v277_v55 = vmul.f32 %v273_v21, %v245_v26  ;;  %v276_v7 = vmul.f32 %v272_v17, %v244_v18  ;;  %v278_v35 = vmul.f32 %v274_v32, %v246_v40  ;;  %v479_v26 = vld [vmem:[%s2938_s2 + $0x4a0] sm:$0xff]  ;;  %v506_v14 = vld [vmem:[%s2938_s2 + $0x578] sm:$0xff] }
  0xae   :  { %v1237_v13 = vpack.c.bf16 %v479_v26, %v475_v4  ;;  %v1365_v58 = vpack.c.bf16 %v481_v63, %v477_v47  ;;  %v495_v59 = vld [vmem:[%s2938_s2 + $0x520] sm:$0xff]  ;;  %v1243_v18 = vpack.c.bf16 %v496_v41, %v492_v10  ;;  %v1373_v21 = vpack.c.bf16 %v497_v22, %v493_v60  ;;  %v517_v26 = vld [vmem:[%s2938_s2 + $0x5d0] sm:$0xff]  ;;  %v528_v47 = vld [vmem:[%s2938_s2 + $0x628] sm:$0xff] }
  0xaf   :  { %v2384_v44 = vmul.f32 %v325_v45, %v277_v55  ;;  %v328_v12 = vmul.f32 %v324_v11, %v276_v7  ;;  %v327_v15 = vmul.f32 %v323_v2, %v275_v31  ;;  %v1231_v45 = vpack.c.bf16 %v472_v46, %v468_v48  ;;  %v494_v11 = vld [vmem:[%s2938_s2 + $0x518] sm:$0xff]  ;;  %v499_v32 = vld [vmem:[%s2938_s2 + $0x540] sm:$0xff]  ;;  %v501_v48 = vld [vmem:[%s2938_s2 + $0x550] sm:$0xff] }
  0xb0   :  { %v330_v49 = vmul.f32 %v326_v25, %v278_v35  ;;  %v498_v2 = vld [vmem:[%s2938_s2 + $0x538] sm:$0xff]  ;;  %v1245_v17 = vpack.c.bf16 %v495_v59, %v491_v27  ;;  %v503_v31 = vld [vmem:[%s2938_s2 + $0x560] sm:$0xff]  ;;  %v1247_v55 = vpack.c.bf16 %v504_v6, %v500_v54  ;;  %v1375_v7 = vpack.c.bf16 %v506_v14, %v502_v61  ;;  %v505_v35 = vld [vmem:[%s2938_s2 + $0x570] sm:$0xff] }
  0xb1   :  { %651 = vmatprep.mubr.f32.mxu0 %v328_v12  ;;  %793 = vmatprep.mubr.f32.mxu1 %v328_v12  ;;  %v1371_v40 = vpack.c.bf16 %v498_v2, %v494_v11  ;;  %v510_v46 = vld [vmem:[%s2938_s2 + $0x598] sm:$0xff]  ;;  %v1249_v24 = vpack.c.bf16 %v503_v31, %v499_v32  ;;  %v1377_v12 = vpack.c.bf16 %v505_v35, %v501_v48  ;;  %v511_v25 = vld [vmem:[%s2938_s2 + $0x5a0] sm:$0xff]  ;;  %v533_v59 = vld [vmem:[%s2938_s2 + $0x650] sm:$0xff] }
  0xb2   :  { %652 = vmatmul.mubr.f32.vlgmr.msra.gmra.mrb[0].mxu0 %v327_v15  ;;  %794 = vmatmul.mubr.f32.vlgmr.msra.gmra.mrb[0].mxu1 %v327_v15  ;;  %v507_v15 = vld [vmem:[%s2938_s2 + $0x580] sm:$0xff]  ;;  %v1379_v34 = vpack.c.bf16 %v514_v5, %v510_v46  ;;  %v526_v63 = vld [vmem:[%s2938_s2 + $0x618] sm:$0xff]  ;;  %v544_v60 = vld [vmem:[%s2938_s2 + $0x6a8] sm:$0xff] }
  0xb3   :  { %1230 = vmatpush1.bf16.msra.mxu0 %v1229_v3  ;;  %1358 = vmatpush1.bf16.msra.mxu1 %v1357_v62  ;;  %v508_v3 = vld [vmem:[%s2938_s2 + $0x588] sm:$0xff]  ;;  %v1253_v43 = vpack.c.bf16 %v511_v25, %v507_v15  ;;  %v1387_v0 = vpack.c.bf16 %v530_v52, %v526_v63  ;;  %v538_v10 = vld [vmem:[%s2938_s2 + $0x678] sm:$0xff]  ;;  %v531_v2 = vld [vmem:[%s2938_s2 + $0x640] sm:$0xff] }
  0xb4   :  { %722 = vmatprep.mubr.f32.mxu0 %v330_v49  ;;  %864 = vmatprep.mubr.f32.mxu1 %v330_v49  ;;  %v512_v62 = vld [vmem:[%s2938_s2 + $0x5a8] sm:$0xff]  ;;  %v515_v49 = vld [vmem:[%s2938_s2 + $0x5c0] sm:$0xff]  ;;  %v1391_v27 = vpack.c.bf16 %v538_v10, %v534_v9  ;;  %v542_v22 = vld [vmem:[%s2938_s2 + $0x698] sm:$0xff] }
  0xb5   :  { %1232 = vmatprep.subr.bf16.mxu0 %v1231_v45  ;;  %1360 = vmatprep.subr.bf16.mxu1 %v1359_v56  ;;  %v1251_v16 = vpack.c.bf16 %v512_v62, %v508_v3  ;;  %v520_v45 = vld [vmem:[%s2938_s2 + $0x5e8] sm:$0xff]  ;;  %v518_v56 = vld [vmem:[%s2938_s2 + $0x5d8] sm:$0xff]  ;;  %v539_v14 = vld [vmem:[%s2938_s2 + $0x680] sm:$0xff] }
  0xb6   :  { %v1383_v4 = vpack.c.bf16 %v522_v39, %v518_v56  ;;  %v546_v54 = vld [vmem:[%s2938_s2 + $0x6b8] sm:$0xff]  ;;  %v541_v31 = vld [vmem:[%s2938_s2 + $0x690] sm:$0xff]  ;;  %v552_v48 = vld [vmem:[%s2938_s2 + $0x6e8] sm:$0xff] }
  0xb7   :  { %1234 = vmatpush1.bf16.msra.mxu0 %v1233_v36  ;;  %1362 = vmatpush1.bf16.msra.mxu1 %v1361_v8  ;;  %v519_v36 = vld [vmem:[%s2938_s2 + $0x5e0] sm:$0xff]  ;;  %v1255_v8 = vpack.c.bf16 %v520_v45, %v516_v38  ;;  %v1395_v32 = vpack.c.bf16 %v546_v54, %v542_v22  ;;  %v550_v35 = vld [vmem:[%s2938_s2 + $0x6d8] sm:$0xff]  ;;  %v549_v25 = vld [vmem:[%s2938_s2 + $0x6d0] sm:$0xff] }
  0xb8   :  { %1236 = vmatprep.subr.bf16.mxu0 %v1235_v20  ;;  %1364 = vmatprep.subr.bf16.mxu1 %v1363_v42  ;;  %v521_v20 = vld [vmem:[%s2938_s2 + $0x5f0] sm:$0xff]  ;;  %v524_v42 = vld [vmem:[%s2938_s2 + $0x608] sm:$0xff]  ;;  %v1257_v53 = vpack.c.bf16 %v519_v36, %v515_v49  ;;  %v554_v3 = vld [vmem:[%s2938_s2 + $0x6f8] sm:$0xff] }
  0xb9   :  { %v1385_v29 = vpack.c.bf16 %v521_v20, %v517_v26  ;;  %v547_v5 = vld [vmem:[%s2938_s2 + $0x6c0] sm:$0xff]  ;;  %v1399_v15 = vpack.c.bf16 %v554_v3, %v550_v35  ;;  %v562_v38 = vld [vmem:[%s2938_s2 + $0x738] sm:$0xff]  ;;  %v557_v36 = vld [vmem:[%s2938_s2 + $0x710] sm:$0xff] }
  0xba   :  { %v555_v39 = vld [vmem:[%s2938_s2 + $0x700] sm:$0xff]  ;;  %v1403_v49 = vpack.c.bf16 %v562_v38, %v558_v37  ;;  %v568_v26 = vld [vmem:[%s2938_s2 + $0x768] sm:$0xff]  ;;  %v566_v20 = vld [vmem:[%s2938_s2 + $0x758] sm:$0xff] }
  0xbb   :  { %1238 = vmatpush1.bf16.msra.mxu0 %v1237_v13  ;;  %1366 = vmatpush1.bf16.msra.mxu1 %v1365_v58  ;;  %v527_v13 = vld [vmem:[%s2938_s2 + $0x620] sm:$0xff]  ;;  %v1259_v58 = vpack.c.bf16 %v528_v47, %v524_v42  ;;  %v570_v42 = vld [vmem:[%s2938_s2 + $0x778] sm:$0xff]  ;;  %v877_v38 = vld [vmem:[%s2939_s3 + $0x10] sm:$0xff] }
  0xbc   :  { %1240 = vmatprep.subr.bf16.mxu0 %v1239_v1  ;;  %1368 = vmatprep.subr.bf16.mxu1 %v1367_v57  ;;  %v529_v1 = vld [vmem:[%s2938_s2 + $0x630] sm:$0xff]  ;;  %v532_v57 = vld [vmem:[%s2938_s2 + $0x648] sm:$0xff]  ;;  %v1261_v41 = vpack.c.bf16 %v527_v13, %v523_v30  ;;  %v563_v52 = vld [vmem:[%s2938_s2 + $0x740] sm:$0xff]  ;;  %v1407_v30 = vpack.c.bf16 %v570_v42, %v566_v20 }
  0xbd   :  { %v1389_v11 = vpack.c.bf16 %v529_v1, %v525_v19  ;;  %v565_v13 = vld [vmem:[%s2938_s2 + $0x750] sm:$0xff]  ;;  %v576_v19 = vld [vmem:[%s2938_s2 + $0x7a8] sm:$0xff]  ;;  %v574_v1 = vld [vmem:[%s2938_s2 + $0x798] sm:$0xff] }
  0xbe   :  { %v571_v10 = vld [vmem:[%s2938_s2 + $0x780] sm:$0xff] }
  0xbf   :  { %1242 = vmatpush1.bf16.msra.mxu0 %v1241_v50  ;;  %1370 = vmatpush1.bf16.msra.mxu1 %v1369_v33  ;;  %v535_v50 = vld [vmem:[%s2938_s2 + $0x660] sm:$0xff]  ;;  %v1263_v33 = vpack.c.bf16 %v536_v23, %v532_v57  ;;  %v578_v57 = vld [vmem:[%s2938_s2 + $0x7b8] sm:$0xff] }
  0xc0   :  { %1244 = vmatprep.subr.bf16.mxu0 %v1243_v18  ;;  %1372 = vmatprep.subr.bf16.mxu1 %v1371_v40  ;;  %v537_v18 = vld [vmem:[%s2938_s2 + $0x670] sm:$0xff]  ;;  %v540_v40 = vld [vmem:[%s2938_s2 + $0x688] sm:$0xff]  ;;  %v1265_v6 = vpack.c.bf16 %v535_v50, %v531_v2  ;;  %v1411_v2 = vpack.c.bf16 %v578_v57, %v574_v1  ;;  %v579_v54 = vld [vmem:[%s2938_s2 + $0x7c0] sm:$0xff] }
  0xc1   :  { %v1393_v61 = vpack.c.bf16 %v537_v18, %v533_v59  ;;  %v573_v50 = vld [vmem:[%s2938_s2 + $0x790] sm:$0xff]  ;;  %v584_v59 = vld [vmem:[%s2938_s2 + $0x7e8] sm:$0xff]  ;;  %v582_v18 = vld [vmem:[%s2938_s2 + $0x7d8] sm:$0xff] }
  0xc2   :  { %v875_v3 = vld [vmem:[%s2939_s3] sm:$0xff]  ;;  %v881_v1 = vld [vmem:[%s2939_s3 + $0x30] sm:$0xff]  ;;  %v882_v57 = vld [vmem:[%s2939_s3 + $0x38] sm:$0xff] }
  0xc3   :  { %1246 = vmatpush1.bf16.msra.mxu0 %v1245_v17  ;;  %1374 = vmatpush1.bf16.msra.mxu1 %v1373_v21  ;;  %v543_v17 = vld [vmem:[%s2938_s2 + $0x6a0] sm:$0xff]  ;;  %v1267_v21 = vpack.c.bf16 %v544_v60, %v540_v40  ;;  %v586_v40 = vld [vmem:[%s2938_s2 + $0x7f8] sm:$0xff] }
  0xc4   :  { %1248 = vmatprep.subr.bf16.mxu0 %v1247_v55  ;;  %1376 = vmatprep.subr.bf16.mxu1 %v1375_v7  ;;  %v545_v55 = vld [vmem:[%s2938_s2 + $0x6b0] sm:$0xff]  ;;  %v548_v7 = vld [vmem:[%s2938_s2 + $0x6c8] sm:$0xff]  ;;  %v1269_v62 = vpack.c.bf16 %v543_v17, %v539_v14  ;;  %v1415_v14 = vpack.c.bf16 %v586_v40, %v582_v18  ;;  %v879_v42 = vld [vmem:[%s2939_s3 + $0x20] sm:$0xff] }
  0xc5   :  { %v1397_v46 = vpack.c.bf16 %v545_v55, %v541_v31  ;;  %v581_v17 = vld [vmem:[%s2938_s2 + $0x7d0] sm:$0xff]  ;;  %v892_v31 = vld [vmem:[%s2939_s3 + $0x88] sm:$0xff]  ;;  %v923_v55 = vld [vmem:[%s2939_s3 + $0x180] sm:$0xff] }
  0xc6   :  { %v883_v18 = vld [vmem:[%s2939_s3 + $0x40] sm:$0xff]  ;;  %v884_v40 = vld [vmem:[%s2939_s3 + $0x48] sm:$0xff] }
  0xc7   :  { %1250 = vmatpush1.bf16.msra.mxu0 %v1249_v24  ;;  %1378 = vmatpush1.bf16.msra.mxu1 %v1377_v12  ;;  %v551_v24 = vld [vmem:[%s2938_s2 + $0x6e0] sm:$0xff]  ;;  %v1271_v12 = vpack.c.bf16 %v552_v48, %v548_v7  ;;  %v924_v7 = vld [vmem:[%s2939_s3 + $0x188] sm:$0xff] }
  0xc8   :  { %1252 = vmatprep.subr.bf16.mxu0 %v1251_v16  ;;  %1380 = vmatprep.subr.bf16.mxu1 %v1379_v34  ;;  %v553_v16 = vld [vmem:[%s2938_s2 + $0x6f0] sm:$0xff]  ;;  %v556_v34 = vld [vmem:[%s2938_s2 + $0x708] sm:$0xff]  ;;  %v1273_v45 = vpack.c.bf16 %v551_v24, %v547_v5  ;;  %v1451_v5 = vpack.c.bf16 %v924_v7, %v923_v55  ;;  %v907_v24 = vld [vmem:[%s2939_s3 + $0x100] sm:$0xff] }
  0xc9   :  { %v1401_v56 = vpack.c.bf16 %v553_v16, %v549_v25  ;;  %v894_v25 = vld [vmem:[%s2939_s3 + $0x98] sm:$0xff]  ;;  %v925_v16 = vld [vmem:[%s2939_s3 + $0x190] sm:$0xff] }
  0xca   :  { %v885_v55 = vld [vmem:[%s2939_s3 + $0x50] sm:$0xff]  ;;  %v886_v7 = vld [vmem:[%s2939_s3 + $0x58] sm:$0xff] }
  0xcb   :  { %1254 = vmatpush1.bf16.msra.mxu0 %v1253_v43  ;;  %1382 = vmatpush1.bf16.msra.mxu1 %v1381_v51  ;;  %v559_v43 = vld [vmem:[%s2938_s2 + $0x720] sm:$0xff]  ;;  %v1275_v51 = vpack.c.bf16 %v560_v28, %v556_v34  ;;  %v926_v34 = vld [vmem:[%s2939_s3 + $0x198] sm:$0xff] }
  0xcc   :  { %1256 = vmatprep.subr.bf16.mxu0 %v1255_v8  ;;  %1384 = vmatprep.subr.bf16.mxu1 %v1383_v4  ;;  %v561_v8 = vld [vmem:[%s2938_s2 + $0x730] sm:$0xff]  ;;  %v564_v4 = vld [vmem:[%s2938_s2 + $0x748] sm:$0xff]  ;;  %v1277_v47 = vpack.c.bf16 %v559_v43, %v555_v39  ;;  %v1455_v39 = vpack.c.bf16 %v926_v34, %v925_v16  ;;  %v887_v16 = vld [vmem:[%s2939_s3 + $0x60] sm:$0xff] }
  0xcd   :  { %v1405_v63 = vpack.c.bf16 %v561_v8, %v557_v36  ;;  %v909_v43 = vld [vmem:[%s2939_s3 + $0x110] sm:$0xff]  ;;  %v896_v36 = vld [vmem:[%s2939_s3 + $0xa8] sm:$0xff]  ;;  %v927_v8 = vld [vmem:[%s2939_s3 + $0x1a0] sm:$0xff] }
  0xcf   :  { %1258 = vmatpush1.bf16.msra.mxu0 %v1257_v53  ;;  %1386 = vmatpush1.bf16.msra.mxu1 %v1385_v29  ;;  %v567_v53 = vld [vmem:[%s2938_s2 + $0x760] sm:$0xff]  ;;  %v1279_v29 = vpack.c.bf16 %v568_v26, %v564_v4  ;;  %v928_v4 = vld [vmem:[%s2939_s3 + $0x1a8] sm:$0xff] }
  0xd0   :  { %1260 = vmatprep.subr.bf16.mxu0 %v1259_v58  ;;  %1388 = vmatprep.subr.bf16.mxu1 %v1387_v0  ;;  %v569_v58 = vld [vmem:[%s2938_s2 + $0x770] sm:$0xff]  ;;  %v572_v0 = vld [vmem:[%s2938_s2 + $0x788] sm:$0xff]  ;;  %v1281_v23 = vpack.c.bf16 %v567_v53, %v563_v52  ;;  %v1459_v52 = vpack.c.bf16 %v928_v4, %v927_v8  ;;  %v938_v8 = vld [vmem:[%s2939_s3 + $0x1f8] sm:$0xff] }
  0xd1   :  { %v1409_v9 = vpack.c.bf16 %v569_v58, %v565_v13  ;;  %v912_v53 = vld [vmem:[%s2939_s3 + $0x128] sm:$0xff]  ;;  %v929_v13 = vld [vmem:[%s2939_s3 + $0x1b0] sm:$0xff]  ;;  %v930_v58 = vld [vmem:[%s2939_s3 + $0x1b8] sm:$0xff] }
  0xd2   :  { %v889_v4 = vld [vmem:[%s2939_s3 + $0x70] sm:$0xff] }
  0xd3   :  { %1262 = vmatpush1.bf16.msra.mxu0 %v1261_v41  ;;  %1390 = vmatpush1.bf16.msra.mxu1 %v1389_v11  ;;  %v575_v41 = vld [vmem:[%s2938_s2 + $0x7a0] sm:$0xff]  ;;  %v1283_v11 = vpack.c.bf16 %v576_v19, %v572_v0 }
  0xd4   :  { %1264 = vmatprep.subr.bf16.mxu0 %v1263_v33  ;;  %1392 = vmatprep.subr.bf16.mxu1 %v1391_v27  ;;  %v577_v33 = vld [vmem:[%s2938_s2 + $0x7b0] sm:$0xff]  ;;  %v580_v27 = vld [vmem:[%s2938_s2 + $0x7c8] sm:$0xff]  ;;  %v1285_v60 = vpack.c.bf16 %v575_v41, %v571_v10  ;;  %v914_v41 = vld [vmem:[%s2939_s3 + $0x138] sm:$0xff] }
  0xd5   :  { %v1413_v22 = vpack.c.bf16 %v577_v33, %v573_v50  ;;  %v913_v10 = vld [vmem:[%s2939_s3 + $0x130] sm:$0xff]  ;;  %v931_v50 = vld [vmem:[%s2939_s3 + $0x1c0] sm:$0xff]  ;;  %v932_v33 = vld [vmem:[%s2939_s3 + $0x1c8] sm:$0xff] }
  0xd7   :  { %1266 = vmatpush1.bf16.msra.mxu0 %v1265_v6  ;;  %1394 = vmatpush1.bf16.msra.mxu1 %v1393_v61  ;;  %v583_v6 = vld [vmem:[%s2938_s2 + $0x7e0] sm:$0xff]  ;;  %v1287_v61 = vpack.c.bf16 %v584_v59, %v580_v27  ;;  %v1433_v27 = vpack.c.bf16 %v882_v57, %v881_v1  ;;  %v1465_v59 = vpack.c.bf16 %v914_v41, %v913_v10  ;;  %v10_v1 = vstv %s2940_s4 }
  0xd8   :  { %1268 = vmatprep.subr.bf16.mxu0 %v1267_v21  ;;  %1396 = vmatprep.subr.bf16.mxu1 %v1395_v32  ;;  %v585_v21 = vld [vmem:[%s2938_s2 + $0x7f0] sm:$0xff]  ;;  %v891_v32 = vld [vmem:[%s2939_s3 + $0x80] sm:$0xff]  ;;  %v1289_v48 = vpack.c.bf16 %v583_v6, %v579_v54  ;;  %v916_v6 = vld [vmem:[%s2939_s3 + $0x148] sm:$0xff]  ;;  %11 = vst [vmem:[#allocation2] sm:$0x1] %v10_v1 }
  0xd9   :  { %v1417_v35 = vpack.c.bf16 %v585_v21, %v581_v17  ;;  %v915_v54 = vld [vmem:[%s2939_s3 + $0x140] sm:$0xff]  ;;  %v933_v17 = vld [vmem:[%s2939_s3 + $0x1d0] sm:$0xff]  ;;  %v934_v21 = vld [vmem:[%s2939_s3 + $0x1d8] sm:$0xff] }
  0xdb   :  { %1270 = vmatpush1.bf16.msra.mxu0 %v1269_v62  ;;  %1398 = vmatpush1.bf16.msra.mxu1 %v1397_v46  ;;  %v876_v62 = vld [vmem:[%s2939_s3 + $0x8] sm:$0xff]  ;;  %v1419_v46 = vpack.c.bf16 %v892_v31, %v891_v32  ;;  %v1437_v32 = vpack.c.bf16 %v884_v40, %v883_v18  ;;  %v1469_v31 = vpack.c.bf16 %v916_v6, %v915_v54 }
  0xdc   :  { %1272 = vmatprep.subr.bf16.mxu0 %v1271_v12  ;;  %1400 = vmatprep.subr.bf16.mxu1 %v1399_v15  ;;  %v908_v12 = vld [vmem:[%s2939_s3 + $0x108] sm:$0xff]  ;;  %v893_v15 = vld [vmem:[%s2939_s3 + $0x90] sm:$0xff]  ;;  %v1421_v28 = vpack.c.bf16 %v876_v62, %v875_v3  ;;  %v918_v62 = vld [vmem:[%s2939_s3 + $0x158] sm:$0xff] }
  0xdd   :  { %v1453_v37 = vpack.c.bf16 %v908_v12, %v907_v24  ;;  %v917_v3 = vld [vmem:[%s2939_s3 + $0x150] sm:$0xff]  ;;  %v935_v24 = vld [vmem:[%s2939_s3 + $0x1e0] sm:$0xff]  ;;  %v936_v12 = vld [vmem:[%s2939_s3 + $0x1e8] sm:$0xff] }
  0xdf   :  { %1274 = vmatpush1.bf16.msra.mxu0 %v1273_v45  ;;  %1402 = vmatpush1.bf16.msra.mxu1 %v1401_v56  ;;  %v878_v45 = vld [vmem:[%s2939_s3 + $0x18] sm:$0xff]  ;;  %v1423_v56 = vpack.c.bf16 %v894_v25, %v893_v15  ;;  %v1441_v15 = vpack.c.bf16 %v886_v7, %v885_v55  ;;  %v1473_v25 = vpack.c.bf16 %v918_v62, %v917_v3 }
  0xe0   :  { %1276 = vmatprep.subr.bf16.mxu0 %v1275_v51  ;;  %1404 = vmatprep.subr.bf16.mxu1 %v1403_v49  ;;  %v910_v51 = vld [vmem:[%s2939_s3 + $0x118] sm:$0xff]  ;;  %v895_v49 = vld [vmem:[%s2939_s3 + $0xa0] sm:$0xff]  ;;  %v1425_v26 = vpack.c.bf16 %v878_v45, %v877_v38  ;;  %v920_v45 = vld [vmem:[%s2939_s3 + $0x168] sm:$0xff] }
  0xe1   :  { %v1457_v20 = vpack.c.bf16 %v910_v51, %v909_v43  ;;  %v919_v38 = vld [vmem:[%s2939_s3 + $0x160] sm:$0xff]  ;;  %v905_v43 = vld [vmem:[%s2939_s3 + $0xf0] sm:$0xff]  ;;  %v906_v51 = vld [vmem:[%s2939_s3 + $0xf8] sm:$0xff] }
  0xe3   :  { %1278 = vmatpush1.bf16.msra.mxu0 %v1277_v47  ;;  %1406 = vmatpush1.bf16.msra.mxu1 %v1405_v63  ;;  %v880_v47 = vld [vmem:[%s2939_s3 + $0x28] sm:$0xff]  ;;  %v1427_v63 = vpack.c.bf16 %v896_v36, %v895_v49  ;;  %v937_v49 = vld [vmem:[%s2939_s3 + $0x1f0] sm:$0xff]  ;;  %v1447_v36 = vpack.c.bf16 %v906_v51, %v905_v43 }
  0xe4   :  { %1280 = vmatprep.subr.bf16.mxu0 %v1279_v29  ;;  %1408 = vmatprep.subr.bf16.mxu1 %v1407_v30  ;;  %v897_v29 = vld [vmem:[%s2939_s3 + $0xb0] sm:$0xff]  ;;  %v898_v30 = vld [vmem:[%s2939_s3 + $0xb8] sm:$0xff]  ;;  %v1429_v0 = vpack.c.bf16 %v880_v47, %v879_v42 }
  0xe5   :  { %v921_v47 = vld [vmem:[%s2939_s3 + $0x170] sm:$0xff] }
  0xe7   :  { %1282 = vmatpush1.bf16.msra.mxu0 %v1281_v23  ;;  %1410 = vmatpush1.bf16.msra.mxu1 %v1409_v9  ;;  %v1431_v23 = vpack.c.bf16 %v898_v30, %v897_v29  ;;  %v1463_v9 = vpack.c.bf16 %v930_v58, %v929_v13 }
  0xe8   :  { %1284 = vmatprep.subr.bf16.mxu0 %v1283_v11  ;;  %1412 = vmatprep.subr.bf16.mxu1 %v1411_v2  ;;  %v899_v11 = vld [vmem:[%s2939_s3 + $0xc0] sm:$0xff]  ;;  %v900_v2 = vld [vmem:[%s2939_s3 + $0xc8] sm:$0xff] }
  0xeb   :  { %1286 = vmatpush1.bf16.msra.mxu0 %v1285_v60  ;;  %1414 = vmatpush1.bf16.msra.mxu1 %v1413_v22  ;;  %v1435_v60 = vpack.c.bf16 %v900_v2, %v899_v11  ;;  %v1467_v22 = vpack.c.bf16 %v932_v33, %v931_v50 }
  0xec   :  { %1288 = vmatprep.subr.bf16.mxu0 %v1287_v61  ;;  %1416 = vmatprep.subr.bf16.mxu1 %v1415_v14  ;;  %v901_v61 = vld [vmem:[%s2939_s3 + $0xd0] sm:$0xff]  ;;  %v902_v14 = vld [vmem:[%s2939_s3 + $0xd8] sm:$0xff] }
  0xef   :  { %1290 = vmatpush1.bf16.msra.mxu0 %v1289_v48  ;;  %1418 = vmatpush1.bf16.msra.mxu1 %v1417_v35  ;;  %v1439_v48 = vpack.c.bf16 %v902_v14, %v901_v61  ;;  %v1471_v35 = vpack.c.bf16 %v934_v21, %v933_v17 }
  0xf0   :  { %1420 = vmatprep.subr.bf16.mxu0 %v1419_v46  ;;  %1452 = vmatprep.subr.bf16.mxu1 %v1451_v5  ;;  %v903_v46 = vld [vmem:[%s2939_s3 + $0xe0] sm:$0xff]  ;;  %v904_v5 = vld [vmem:[%s2939_s3 + $0xe8] sm:$0xff] }
  0xf1   :  { %v1443_v34 = vpack.c.bf16 %v904_v5, %v903_v46 }
  0xf2   :  { %723 = vmatmul.mubr.f32.vlgmr.msra.gmra.mrb[0].mxu0 %v2384_v44  ;;  %865 = vmatmul.mubr.f32.vlgmr.msra.gmra.mrb[0].mxu1 %v2384_v44  ;;  %v911_v44 = vld [vmem:[%s2939_s3 + $0x120] sm:$0xff] }
  0xf3   :  { %1422 = vmatpush3.bf16.msra.mxu0 %v1421_v28  ;;  %1454 = vmatpush3.bf16.msra.mxu1 %v1453_v37  ;;  %v1461_v19 = vpack.c.bf16 %v912_v53, %v911_v44  ;;  %v1475_v28 = vpack.c.bf16 %v936_v12, %v935_v24  ;;  %v888_v37 = vld [vmem:[%s2939_s3 + $0x68] sm:$0xff] }
  0xf4   :  { %1424 = vmatprep.subr.bf16.mxu0 %v1423_v56  ;;  %1456 = vmatprep.subr.bf16.mxu1 %v1455_v39  ;;  %v1445_v56 = vpack.c.bf16 %v888_v37, %v887_v16  ;;  %v1477_v39 = vpack.c.bf16 %v920_v45, %v919_v38 }
  0xf7   :  { %1426 = vmatpush3.bf16.msra.mxu0 %v1425_v26  ;;  %1458 = vmatpush3.bf16.msra.mxu1 %v1457_v20  ;;  %v890_v26 = vld [vmem:[%s2939_s3 + $0x78] sm:$0xff]  ;;  %v1479_v20 = vpack.c.bf16 %v938_v8, %v937_v49 }
  0xf8   :  { %1428 = vmatprep.subr.bf16.mxu0 %v1427_v63  ;;  %1460 = vmatprep.subr.bf16.mxu1 %v1459_v52  ;;  %v1449_v42 = vpack.c.bf16 %v890_v26, %v889_v4  ;;  %v922_v63 = vld [vmem:[%s2939_s3 + $0x178] sm:$0xff] }
  0xf9   :  { %v1481_v52 = vpack.c.bf16 %v922_v63, %v921_v47 }
  0xfb   :  { %1430 = vmatpush3.bf16.msra.mxu0 %v1429_v0  ;;  %1462 = vmatpush3.bf16.msra.mxu1 %v1461_v19 }
  0xfc   :  { %1432 = vmatprep.subr.bf16.mxu0 %v1431_v23  ;;  %1464 = vmatprep.subr.bf16.mxu1 %v1463_v9  ;;  %v1092_v9 = vld [vmem:[#allocation2] ss:$0 sm:$0xff] }
  0xff   :  { %1434 = vmatpush3.bf16.msra.mxu0 %v1433_v27  ;;  %1466 = vmatpush3.bf16.msra.mxu1 %v1465_v59 }
 0x100   :  { %1436 = vmatprep.subr.bf16.mxu0 %v1435_v60  ;;  %1468 = vmatprep.subr.bf16.mxu1 %v1467_v22 }
 0x103   :  { %1438 = vmatpush3.bf16.msra.mxu0 %v1437_v32  ;;  %1470 = vmatpush3.bf16.msra.mxu1 %v1469_v31 }
 0x104   :  { %1440 = vmatprep.subr.bf16.mxu0 %v1439_v48  ;;  %1472 = vmatprep.subr.bf16.mxu1 %v1471_v35 }
 0x107   :  { %1442 = vmatpush3.bf16.msra.mxu0 %v1441_v15  ;;  %1474 = vmatpush3.bf16.msra.mxu1 %v1473_v25 }
 0x108   :  { %1444 = vmatprep.subr.bf16.mxu0 %v1443_v34  ;;  %1476 = vmatprep.subr.bf16.mxu1 %v1475_v28 }
 0x10b   :  { %1446 = vmatpush3.bf16.msra.mxu0 %v1445_v56  ;;  %1478 = vmatpush3.bf16.msra.mxu1 %v1477_v39 }
 0x10c   :  { %1448 = vmatprep.subr.bf16.mxu0 %v1447_v36  ;;  %1480 = vmatprep.subr.bf16.mxu1 %v1479_v20 }
 0x10f   :  { %1450 = vmatpush3.bf16.msra.mxu0 %v1449_v42  ;;  %1482 = vmatpush3.bf16.msra.mxu1 %v1481_v52 }
 0x1c5   :  { %v724_v44 = vpop.f32.mrb[0].mxu0  ;;  %v866_v53 = vpop.f32.mrb[0].mxu1 }
 0x1c6   :  { %v726_v29 = vpop.f32.mrb[1].mxu0  ;;  %v868_v30 = vpop.f32.mrb[1].mxu1  ;;  %v871_v0 = vmul.f32 %v724_v44, %v724_v44  ;;  %v873_v19 = vmul.f32 %v866_v53, %v866_v53 }
 0x1c7   :  { %v872_v13 = vmul.f32 %v726_v29, %v726_v29  ;;  %v874_v58 = vmul.f32 %v868_v30, %v868_v30 }
 0x1c9   :  { %1010 = vmatprep.mubr.f32.mxu0 %v872_v13  ;;  %1080 = vmatprep.mubr.f32.mxu1 %v874_v58 }
 0x1ca   :  { %1011 = vmatmul.mubr.f32.vlgmr.msra.gmra.mrb[2].mxu0 %v871_v0  ;;  %1081 = vmatmul.mubr.f32.vlgmr.msra.gmra.mrb[2].mxu1 %v873_v19 }
 0x29d   :  { %v1125_v57 = vpop.f32.mrb[2].mxu0  ;;  %v1160_v23 = vpop.f32.mrb[2].mxu1 }
 0x29e   :  { %v1126_v10 = vpop.f32.mrb[3].mxu0  ;;  %v1161_v41 = vpop.f32.mrb[3].mxu1 }
 0x29f   :  { %v1127_v11 = vadd.f32 %v1126_v10, %v1125_v57  ;;  %v1162_v2 = vadd.f32 %v1161_v41, %v1160_v23 }
 0x2a1   :  { %v1013_v50 = vadd.f32 %v1127_v11, %v1092_v9 }
 0x2a3   :  { %v1083_v33 = vadd.f32 %v1162_v2, %v1013_v50 }
 0x2a5   :  { %1087 = vst.msk [vmem:[%s2941_s5] sm:$0xff] %vm1086_vm0, %v1083_v33 }

</bundles_post_ra>
